<compile_context>
chip_gen: v5e
topology: v5e:2x2
jax: 0.10.0
libtpu: 0.0.40
codegen_flags: <defaults>
</compile_context>

<pallas_src>
import math

import jax
import jax.numpy as jnp
from jax.experimental import pallas as pl
from jax.experimental.pallas import tpu as pltpu

# ---------------------------------------------------------------------------
# Model hyper-parameters (small synthetic config consistent with the module).
# ---------------------------------------------------------------------------
VOCAB = 100
HIDDEN = 32          # stands in for 768/1024 of xlm-roberta
N_HEADS = 4
HEAD_DIM = HIDDEN // N_HEADS
INTERMEDIATE = 64
N_LAYERS = 2
MAX_POS = 64
TYPE_VOCAB = 2
NUM_CLASSES = 6      # len(task_data['techniques_encoded'].iloc[0]) stand-in
PAD_IDX = 1          # roberta padding idx
LN_EPS = 1e-5

BATCH = 2
SEQ = 8


# ---------------------------------------------------------------------------
# Fused encoder + pooler + classifier kernel (one grid step == one batch element).
# ---------------------------------------------------------------------------
def _encoder_kernel(emb_ref, mask_ref, eg_ref, eb_ref,
                    wqkv_ref, bqkv_ref, wo_ref, bo_ref,
                    ln1g_ref, ln1b_ref, w1_ref, b1_ref,
                    w2_ref, b2_ref, ln2g_ref, ln2b_ref,
                    poolw_ref, poolb_ref, clsw_ref, clsb_ref,
                    o_ref, qkv_ref, ctx_ref):
    inv_sqrt2 = 1.0 / math.sqrt(2.0)
    scale = 1.0 / math.sqrt(HEAD_DIM)

    def layer_norm(x, g, b):
        mean = jnp.mean(x, axis=-1, keepdims=True)
        var = jnp.mean((x - mean) ** 2, axis=-1, keepdims=True)
        return (x - mean) * jax.lax.rsqrt(var + LN_EPS) * g + b

    mask = mask_ref[0]                                         # (1, S) additive mask
    h = layer_norm(emb_ref[0], eg_ref[...], eb_ref[...])       # (S, H)

    for l in range(N_LAYERS):                                  # static unroll (L=2)
        # ---- fused QKV projection -------------------------------------------------
        qkv_ref[...] = (jnp.dot(h, wqkv_ref[l],
                                preferred_element_type=jnp.float32)
                        + bqkv_ref[l])                         # (S, 3H) in VMEM

        # ---- multi-head attention, heads split in-kernel (no XLA transposes) ------
        for hh in range(N_HEADS):
            c0 = hh * HEAD_DIM
            q_h = qkv_ref[:, c0:c0 + HEAD_DIM]                               # (S, dH)
            k_h = qkv_ref[:, HIDDEN + c0:HIDDEN + c0 + HEAD_DIM]             # (S, dH)
            v_h = qkv_ref[:, 2 * HIDDEN + c0:2 * HIDDEN + c0 + HEAD_DIM]     # (S, dH)

            s = jnp.dot(q_h, k_h.T, preferred_element_type=jnp.float32) * scale + mask
            s = s - jnp.max(s, axis=-1, keepdims=True)
            p = jnp.exp(s)
            p = p * pl.reciprocal(jnp.sum(p, axis=-1, keepdims=True), approx=True)
            ctx_ref[:, c0:c0 + HEAD_DIM] = jnp.dot(
                p, v_h, preferred_element_type=jnp.float32)

        # ---- o-projection + residual + LayerNorm (fused epilogue) -----------------
        attn = (jnp.dot(ctx_ref[...], wo_ref[l],
                        preferred_element_type=jnp.float32) + bo_ref[l])
        h1 = layer_norm(attn + h, ln1g_ref[l], ln1b_ref[l])

        # ---- FFN (w1 + exact-erf GELU + w2) + residual + LayerNorm -----------------
        f = jnp.dot(h1, w1_ref[l], preferred_element_type=jnp.float32) + b1_ref[l]
        f = 0.5 * f * (1.0 + jax.lax.erf(f * inv_sqrt2))
        f = jnp.dot(f, w2_ref[l], preferred_element_type=jnp.float32) + b2_ref[l]
        h = layer_norm(f + h1, ln2g_ref[l], ln2b_ref[l])

    # ---- pooler (tanh on CLS token) + classifier, fused ----------------------------
    # torch.nn.Dropout(0.4) is identity in eval/inference mode.
    # TODO(synk): training-mode dropout (random mask + 1/(1-p) scaling) not applied.
    cls_row = h[0:1, :]                                        # (1, H)
    pooled = jnp.tanh(jnp.dot(cls_row, poolw_ref[...],
                              preferred_element_type=jnp.float32) + poolb_ref[...])
    logits = jnp.dot(pooled, clsw_ref[...],
                     preferred_element_type=jnp.float32) + clsb_ref[...]
    o_ref[0] = logits.astype(o_ref.dtype)                      # (1, C)


def _full3(shape):
    return pl.BlockSpec(shape, lambda b: (0, 0, 0))


def _full2(shape):
    return pl.BlockSpec(shape, lambda b: (0, 0))


def xlm_roberta_base_forward(params, ids, attention_mask, token_type_ids):
    B, S = ids.shape

    # Embedding gathers stay in plain JAX (glue); everything else is one Pallas kernel.
    word = params["word_emb"][ids]                                      # (B,S,H)
    not_pad = (ids != PAD_IDX).astype(jnp.int32)
    pos_ids = jnp.cumsum(not_pad, axis=1) * not_pad + PAD_IDX           # HF roberta pos ids
    pos = params["pos_emb"][pos_ids]                                    # (B,S,H)
    tok = params["type_emb"][token_type_ids]                            # (B,S,H)
    emb = (word + pos + tok).astype(jnp.float32)                        # (B,S,H)

    add_mask = ((1.0 - attention_mask.astype(jnp.float32)) * -1e9).reshape(B, 1, S)

    logits = pl.pallas_call(
        _encoder_kernel,
        out_shape=jax.ShapeDtypeStruct((B, 1, NUM_CLASSES), jnp.float32),
        grid=(B,),
        in_specs=[
            pl.BlockSpec((1, S, HIDDEN), lambda b: (b, 0, 0)),          # emb
            pl.BlockSpec((1, 1, S), lambda b: (b, 0, 0)),               # additive mask
            _full2((1, HIDDEN)),                                        # emb_ln_g
            _full2((1, HIDDEN)),                                        # emb_ln_b
            _full3((N_LAYERS, HIDDEN, 3 * HIDDEN)),                     # wqkv
            _full3((N_LAYERS, 1, 3 * HIDDEN)),                          # bqkv
            _full3((N_LAYERS, HIDDEN, HIDDEN)),                         # wo
            _full3((N_LAYERS, 1, HIDDEN)),                              # bo
            _full3((N_LAYERS, 1, HIDDEN)),                              # ln1_g
            _full3((N_LAYERS, 1, HIDDEN)),                              # ln1_b
            _full3((N_LAYERS, HIDDEN, INTERMEDIATE)),                   # w1
            _full3((N_LAYERS, 1, INTERMEDIATE)),                        # b1
            _full3((N_LAYERS, INTERMEDIATE, HIDDEN)),                   # w2
            _full3((N_LAYERS, 1, HIDDEN)),                              # b2
            _full3((N_LAYERS, 1, HIDDEN)),                              # ln2_g
            _full3((N_LAYERS, 1, HIDDEN)),                              # ln2_b
            _full2((HIDDEN, HIDDEN)),                                   # pool_w
            _full2((1, HIDDEN)),                                        # pool_b
            _full2((HIDDEN, NUM_CLASSES)),                              # cls_w
            _full2((1, NUM_CLASSES)),                                   # cls_b
        ],
        out_specs=pl.BlockSpec((1, 1, NUM_CLASSES), lambda b: (b, 0, 0)),
        scratch_shapes=[
            pltpu.VMEM((S, 3 * HIDDEN), jnp.float32),                   # fused QKV
            pltpu.VMEM((S, HIDDEN), jnp.float32),                       # attention ctx
        ],
        compiler_params=pltpu.CompilerParams(
            dimension_semantics=("parallel",)),
    )(
        emb, add_mask,
        params["emb_ln_g"], params["emb_ln_b"],
        params["wqkv"], params["bqkv"], params["wo"], params["bo"],
        params["ln1_g"], params["ln1_b"], params["w1"], params["b1"],
        params["w2"], params["b2"], params["ln2_g"], params["ln2_b"],
        params["pool_w"], params["pool_b"], params["cls_w"], params["cls_b"],
    )
    return logits.reshape(B, NUM_CLASSES)


# ---------------------------------------------------------------------------
# Deterministic parameter initialization (synthetic weights, roberta-style shapes;
# per-layer weights stacked along a leading N_LAYERS axis, QKV pre-concatenated).
# ---------------------------------------------------------------------------
def init_params(key):
    def nrm(k, shape, scale=0.02):
        return scale * jax.random.normal(k, shape, dtype=jnp.float32)

    keys = iter(jax.random.split(key, 5 + N_LAYERS * 6))

    wqkv, bqkv, wo, bo = [], [], [], []
    ln1g, ln1b, w1, b1, w2, b2, ln2g, ln2b = [], [], [], [], [], [], [], []
    for _ in range(N_LAYERS):
        wq = nrm(next(keys), (HIDDEN, HIDDEN))
        wk = nrm(next(keys), (HIDDEN, HIDDEN))
        wv = nrm(next(keys), (HIDDEN, HIDDEN))
        wqkv.append(jnp.concatenate([wq, wk, wv], axis=1))              # (H, 3H)
        bqkv.append(jnp.zeros((1, 3 * HIDDEN), jnp.float32))
        wo.append(nrm(next(keys), (HIDDEN, HIDDEN)))
        bo.append(jnp.zeros((1, HIDDEN), jnp.float32))
        ln1g.append(jnp.ones((1, HIDDEN), jnp.float32))
        ln1b.append(jnp.zeros((1, HIDDEN), jnp.float32))
        w1.append(nrm(next(keys), (HIDDEN, INTERMEDIATE)))
        b1.append(jnp.zeros((1, INTERMEDIATE), jnp.float32))
        w2.append(nrm(next(keys), (INTERMEDIATE, HIDDEN)))
        b2.append(jnp.zeros((1, HIDDEN), jnp.float32))
        ln2g.append(jnp.ones((1, HIDDEN), jnp.float32))
        ln2b.append(jnp.zeros((1, HIDDEN), jnp.float32))

    return {
        "word_emb": nrm(next(keys), (VOCAB, HIDDEN)),
        "pos_emb": nrm(next(keys), (MAX_POS, HIDDEN)),
        "type_emb": nrm(next(keys), (TYPE_VOCAB, HIDDEN)),
        "emb_ln_g": jnp.ones((1, HIDDEN), jnp.float32),
        "emb_ln_b": jnp.zeros((1, HIDDEN), jnp.float32),
        "wqkv": jnp.stack(wqkv), "bqkv": jnp.stack(bqkv),
        "wo": jnp.stack(wo), "bo": jnp.stack(bo),
        "ln1_g": jnp.stack(ln1g), "ln1_b": jnp.stack(ln1b),
        "w1": jnp.stack(w1), "b1": jnp.stack(b1),
        "w2": jnp.stack(w2), "b2": jnp.stack(b2),
        "ln2_g": jnp.stack(ln2g), "ln2_b": jnp.stack(ln2b),
        "pool_w": nrm(next(keys), (HIDDEN, HIDDEN)),
        "pool_b": jnp.zeros((1, HIDDEN), jnp.float32),
        "cls_w": nrm(next(keys), (HIDDEN, NUM_CLASSES)),
        "cls_b": jnp.zeros((1, NUM_CLASSES), jnp.float32),
    }


if __name__ == "__main__":
    key = jax.random.PRNGKey(0)
    pkey, ikey = jax.random.split(key)

    params = init_params(pkey)

    ids = jax.random.randint(ikey, (BATCH, SEQ), minval=3, maxval=VOCAB, dtype=jnp.int32)
    attention_mask = jnp.ones((BATCH, SEQ), dtype=jnp.int32)
    token_type_ids = jnp.zeros((BATCH, SEQ), dtype=jnp.int32)

    logits = xlm_roberta_base_forward(params, ids, attention_mask, token_type_ids)
    logits = jax.block_until_ready(logits)

    assert logits.shape == (BATCH, NUM_CLASSES)
    assert bool(jnp.all(jnp.isfinite(logits)))
    print("KERNEL_OK")
</pallas_src>

<mosaic_0001>
module attributes {stable_mosaic.version = 11 : i64} {
  func.func @_encoder_kernel(%arg0: i32, %arg1: memref<1x8x32xf32, #tpu.memory_space<vmem>>, %arg2: memref<1x1x8xf32, #tpu.memory_space<vmem>>, %arg3: memref<1x32xf32, #tpu.memory_space<vmem>>, %arg4: memref<1x32xf32, #tpu.memory_space<vmem>>, %arg5: memref<2x32x96xf32, #tpu.memory_space<vmem>>, %arg6: memref<2x1x96xf32, #tpu.memory_space<vmem>>, %arg7: memref<2x32x32xf32, #tpu.memory_space<vmem>>, %arg8: memref<2x1x32xf32, #tpu.memory_space<vmem>>, %arg9: memref<2x1x32xf32, #tpu.memory_space<vmem>>, %arg10: memref<2x1x32xf32, #tpu.memory_space<vmem>>, %arg11: memref<2x32x64xf32, #tpu.memory_space<vmem>>, %arg12: memref<2x1x64xf32, #tpu.memory_space<vmem>>, %arg13: memref<2x64x32xf32, #tpu.memory_space<vmem>>, %arg14: memref<2x1x32xf32, #tpu.memory_space<vmem>>, %arg15: memref<2x1x32xf32, #tpu.memory_space<vmem>>, %arg16: memref<2x1x32xf32, #tpu.memory_space<vmem>>, %arg17: memref<32x32xf32, #tpu.memory_space<vmem>>, %arg18: memref<1x32xf32, #tpu.memory_space<vmem>>, %arg19: memref<32x6xf32, #tpu.memory_space<vmem>>, %arg20: memref<1x6xf32, #tpu.memory_space<vmem>>, %arg21: memref<1x1x6xf32, #tpu.memory_space<vmem>>, %arg22: memref<8x96xf32, #tpu.memory_space<vmem>>, %arg23: memref<8x32xf32, #tpu.memory_space<vmem>>) attributes {dimension_semantics = [#tpu.dimension_semantics<parallel>], iteration_bounds = array<i64: 2>, scalar_prefetch = 0 : i64, scratch_operands = 2 : i64, tpu.core_type = #tpu.core_type<tc>, window_params = [{transform_indices = @transform_0, window_bounds = array<i64: 1, 8, 32>}, {transform_indices = @transform_1, window_bounds = array<i64: 1, 1, 8>}, {pipeline_mode = #tpu.pipeline_mode<synchronous>, transform_indices = @transform_2, window_bounds = array<i64: 1, 32>}, {pipeline_mode = #tpu.pipeline_mode<synchronous>, transform_indices = @transform_3, window_bounds = array<i64: 1, 32>}, {pipeline_mode = #tpu.pipeline_mode<synchronous>, transform_indices = @transform_4, window_bounds = array<i64: 2, 32, 96>}, {pipeline_mode = #tpu.pipeline_mode<synchronous>, transform_indices = @transform_5, window_bounds = array<i64: 2, 1, 96>}, {pipeline_mode = #tpu.pipeline_mode<synchronous>, transform_indices = @transform_6, window_bounds = array<i64: 2, 32, 32>}, {pipeline_mode = #tpu.pipeline_mode<synchronous>, transform_indices = @transform_7, window_bounds = array<i64: 2, 1, 32>}, {pipeline_mode = #tpu.pipeline_mode<synchronous>, transform_indices = @transform_8, window_bounds = array<i64: 2, 1, 32>}, {pipeline_mode = #tpu.pipeline_mode<synchronous>, transform_indices = @transform_9, window_bounds = array<i64: 2, 1, 32>}, {pipeline_mode = #tpu.pipeline_mode<synchronous>, transform_indices = @transform_10, window_bounds = array<i64: 2, 32, 64>}, {pipeline_mode = #tpu.pipeline_mode<synchronous>, transform_indices = @transform_11, window_bounds = array<i64: 2, 1, 64>}, {pipeline_mode = #tpu.pipeline_mode<synchronous>, transform_indices = @transform_12, window_bounds = array<i64: 2, 64, 32>}, {pipeline_mode = #tpu.pipeline_mode<synchronous>, transform_indices = @transform_13, window_bounds = array<i64: 2, 1, 32>}, {pipeline_mode = #tpu.pipeline_mode<synchronous>, transform_indices = @transform_14, window_bounds = array<i64: 2, 1, 32>}, {pipeline_mode = #tpu.pipeline_mode<synchronous>, transform_indices = @transform_15, window_bounds = array<i64: 2, 1, 32>}, {pipeline_mode = #tpu.pipeline_mode<synchronous>, transform_indices = @transform_16, window_bounds = array<i64: 32, 32>}, {pipeline_mode = #tpu.pipeline_mode<synchronous>, transform_indices = @transform_17, window_bounds = array<i64: 1, 32>}, {pipeline_mode = #tpu.pipeline_mode<synchronous>, transform_indices = @transform_18, window_bounds = array<i64: 32, 6>}, {pipeline_mode = #tpu.pipeline_mode<synchronous>, transform_indices = @transform_19, window_bounds = array<i64: 1, 6>}, {transform_indices = @transform_20, window_bounds = array<i64: 1, 1, 6>}]} {
    %c0 = arith.constant 0 : index
    %c0_0 = arith.constant 0 : index
    %c0_1 = arith.constant 0 : index
    %0 = vector.load %arg2[%c0, %c0_0, %c0_1] : memref<1x1x8xf32, #tpu.memory_space<vmem>>, vector<1x1x8xf32>
    %1 = vector.shape_cast %0 : vector<1x1x8xf32> to vector<1x8xf32>
    %c0_2 = arith.constant 0 : index
    %c0_3 = arith.constant 0 : index
    %c0_4 = arith.constant 0 : index
    %2 = vector.load %arg1[%c0_2, %c0_3, %c0_4] : memref<1x8x32xf32, #tpu.memory_space<vmem>>, vector<1x8x32xf32>
    %3 = vector.shape_cast %2 : vector<1x8x32xf32> to vector<8x32xf32>
    %c0_5 = arith.constant 0 : index
    %c0_6 = arith.constant 0 : index
    %4 = vector.load %arg3[%c0_5, %c0_6] : memref<1x32xf32, #tpu.memory_space<vmem>>, vector<1x32xf32>
    %c0_7 = arith.constant 0 : index
    %c0_8 = arith.constant 0 : index
    %5 = vector.load %arg4[%c0_7, %c0_8] : memref<1x32xf32, #tpu.memory_space<vmem>>, vector<1x32xf32>
    %cst = arith.constant dense<0.000000e+00> : vector<8xf32>
    %6 = vector.multi_reduction <add>, %3, %cst [1] : vector<8x32xf32> to vector<8xf32>
    %7 = vector.shape_cast %6 : vector<8xf32> to vector<8x1xf32>
    %cst_9 = arith.constant 3.200000e+01 : f32
    %8 = vector.broadcast %cst_9 : f32 to vector<8x1xf32>
    %9 = arith.divf %7, %8 : vector<8x1xf32>
    %10 = vector.broadcast %9 : vector<8x1xf32> to vector<8x32xf32>
    %11 = arith.subf %3, %10 : vector<8x32xf32>
    %12 = arith.mulf %11, %11 : vector<8x32xf32>
    %cst_10 = arith.constant dense<0.000000e+00> : vector<8xf32>
    %13 = vector.multi_reduction <add>, %12, %cst_10 [1] : vector<8x32xf32> to vector<8xf32>
    %14 = vector.shape_cast %13 : vector<8xf32> to vector<8x1xf32>
    %cst_11 = arith.constant 3.200000e+01 : f32
    %15 = vector.broadcast %cst_11 : f32 to vector<8x1xf32>
    %16 = arith.divf %14, %15 : vector<8x1xf32>
    %17 = vector.broadcast %9 : vector<8x1xf32> to vector<8x32xf32>
    %18 = arith.subf %3, %17 : vector<8x32xf32>
    %cst_12 = arith.constant 9.99999974E-6 : f32
    %19 = vector.broadcast %cst_12 : f32 to vector<8x1xf32>
    %20 = arith.addf %16, %19 : vector<8x1xf32>
    %21 = math.rsqrt %20 : vector<8x1xf32>
    %22 = vector.broadcast %21 : vector<8x1xf32> to vector<8x32xf32>
    %23 = arith.mulf %18, %22 : vector<8x32xf32>
    %24 = vector.broadcast %4 : vector<1x32xf32> to vector<8x32xf32>
    %25 = arith.mulf %23, %24 : vector<8x32xf32>
    %26 = vector.broadcast %5 : vector<1x32xf32> to vector<8x32xf32>
    %27 = arith.addf %25, %26 : vector<8x32xf32>
    %c0_13 = arith.constant 0 : index
    %c0_14 = arith.constant 0 : index
    %c0_15 = arith.constant 0 : index
    %28 = vector.load %arg5[%c0_13, %c0_14, %c0_15] : memref<2x32x96xf32, #tpu.memory_space<vmem>>, vector<1x32x96xf32>
    %29 = vector.shape_cast %28 : vector<1x32x96xf32> to vector<32x96xf32>
    %cst_16 = arith.constant dense<0.000000e+00> : vector<8x96xf32>
    %30 = tpu.matmul %27, %29, %cst_16 {dimension_numbers = #tpu.dot_dimension_numbers<[1], [0], [0], [1], [0, 0, 1, 1], [], []>} : vector<8x32xf32>, vector<32x96xf32>, vector<8x96xf32> -> vector<8x96xf32>
    %c0_17 = arith.constant 0 : index
    %c0_18 = arith.constant 0 : index
    %c0_19 = arith.constant 0 : index
    %31 = vector.load %arg6[%c0_17, %c0_18, %c0_19] : memref<2x1x96xf32, #tpu.memory_space<vmem>>, vector<1x1x96xf32>
    %32 = vector.shape_cast %31 : vector<1x1x96xf32> to vector<1x96xf32>
    %33 = vector.broadcast %32 : vector<1x96xf32> to vector<8x96xf32>
    %34 = arith.addf %30, %33 : vector<8x96xf32>
    %c0_20 = arith.constant 0 : index
    %c0_21 = arith.constant 0 : index
    %35 = vector.load %arg22[%c0_20, %c0_21] : memref<8x96xf32, #tpu.memory_space<vmem>>, vector<8x96xf32>
    tpu.vector_store %arg22[%c0_20, %c0_21], %34 {strides = array<i32>} : memref<8x96xf32, #tpu.memory_space<vmem>>, vector<8x96xf32>,
    %c0_22 = arith.constant 0 : index
    %c0_23 = arith.constant 0 : index
    %36 = vector.load %arg22[%c0_22, %c0_23] : memref<8x96xf32, #tpu.memory_space<vmem>>, vector<8x8xf32>
    %c0_24 = arith.constant 0 : index
    %c32 = arith.constant 32 : index
    %37 = vector.load %arg22[%c0_24, %c32] : memref<8x96xf32, #tpu.memory_space<vmem>>, vector<8x8xf32>
    %c0_25 = arith.constant 0 : index
    %c64 = arith.constant 64 : index
    %38 = vector.load %arg22[%c0_25, %c64] : memref<8x96xf32, #tpu.memory_space<vmem>>, vector<8x8xf32>
    %39 = tpu.transpose %37, [1, 0] : vector<8x8xf32> -> vector<8x8xf32>
    %cst_26 = arith.constant dense<0.000000e+00> : vector<8x8xf32>
    %40 = tpu.matmul %36, %39, %cst_26 {dimension_numbers = #tpu.dot_dimension_numbers<[1], [0], [0], [1], [0, 0, 1, 1], [], []>} : vector<8x8xf32>, vector<8x8xf32>, vector<8x8xf32> -> vector<8x8xf32>
    %cst_27 = arith.constant 0.353553385 : f32
    %41 = vector.broadcast %cst_27 : f32 to vector<8x8xf32>
    %42 = arith.mulf %40, %41 : vector<8x8xf32>
    %43 = vector.broadcast %1 : vector<1x8xf32> to vector<8x8xf32>
    %44 = arith.addf %42, %43 : vector<8x8xf32>
    %cst_28 = arith.constant dense<0xFF800000> : vector<8xf32>
    %45 = vector.multi_reduction <maximumf>, %44, %cst_28 [1] : vector<8x8xf32> to vector<8xf32>
    %46 = vector.shape_cast %45 : vector<8xf32> to vector<8x1xf32>
    %47 = vector.broadcast %46 : vector<8x1xf32> to vector<8x8xf32>
    %48 = arith.subf %44, %47 : vector<8x8xf32>
    %49 = math.exp %48 : vector<8x8xf32>
    %cst_29 = arith.constant dense<0.000000e+00> : vector<8xf32>
    %50 = vector.multi_reduction <add>, %49, %cst_29 [1] : vector<8x8xf32> to vector<8xf32>
    %51 = vector.shape_cast %50 : vector<8xf32> to vector<8x1xf32>
    %52 = tpu.reciprocal %51 {approx = true} : vector<8x1xf32> -> vector<8x1xf32>
    %53 = vector.broadcast %52 : vector<8x1xf32> to vector<8x8xf32>
    %54 = arith.mulf %49, %53 : vector<8x8xf32>
    %cst_30 = arith.constant dense<0.000000e+00> : vector<8x8xf32>
    %55 = tpu.matmul %54, %38, %cst_30 {dimension_numbers = #tpu.dot_dimension_numbers<[1], [0], [0], [1], [0, 0, 1, 1], [], []>} : vector<8x8xf32>, vector<8x8xf32>, vector<8x8xf32> -> vector<8x8xf32>
    %c0_31 = arith.constant 0 : index
    %c0_32 = arith.constant 0 : index
    %56 = vector.load %arg23[%c0_31, %c0_32] : memref<8x32xf32, #tpu.memory_space<vmem>>, vector<8x8xf32>
    tpu.vector_store %arg23[%c0_31, %c0_32], %55 {strides = array<i32>} : memref<8x32xf32, #tpu.memory_space<vmem>>, vector<8x8xf32>,
    %c0_33 = arith.constant 0 : index
    %c8 = arith.constant 8 : index
    %57 = vector.load %arg22[%c0_33, %c8] : memref<8x96xf32, #tpu.memory_space<vmem>>, vector<8x8xf32>
    %c0_34 = arith.constant 0 : index
    %c40 = arith.constant 40 : index
    %58 = vector.load %arg22[%c0_34, %c40] : memref<8x96xf32, #tpu.memory_space<vmem>>, vector<8x8xf32>
    %c0_35 = arith.constant 0 : index
    %c72 = arith.constant 72 : index
    %59 = vector.load %arg22[%c0_35, %c72] : memref<8x96xf32, #tpu.memory_space<vmem>>, vector<8x8xf32>
    %60 = tpu.transpose %58, [1, 0] : vector<8x8xf32> -> vector<8x8xf32>
    %cst_36 = arith.constant dense<0.000000e+00> : vector<8x8xf32>
    %61 = tpu.matmul %57, %60, %cst_36 {dimension_numbers = #tpu.dot_dimension_numbers<[1], [0], [0], [1], [0, 0, 1, 1], [], []>} : vector<8x8xf32>, vector<8x8xf32>, vector<8x8xf32> -> vector<8x8xf32>
    %cst_37 = arith.constant 0.353553385 : f32
    %62 = vector.broadcast %cst_37 : f32 to vector<8x8xf32>
    %63 = arith.mulf %61, %62 : vector<8x8xf32>
    %64 = vector.broadcast %1 : vector<1x8xf32> to vector<8x8xf32>
    %65 = arith.addf %63, %64 : vector<8x8xf32>
    %cst_38 = arith.constant dense<0xFF800000> : vector<8xf32>
    %66 = vector.multi_reduction <maximumf>, %65, %cst_38 [1] : vector<8x8xf32> to vector<8xf32>
    %67 = vector.shape_cast %66 : vector<8xf32> to vector<8x1xf32>
    %68 = vector.broadcast %67 : vector<8x1xf32> to vector<8x8xf32>
    %69 = arith.subf %65, %68 : vector<8x8xf32>
    %70 = math.exp %69 : vector<8x8xf32>
    %cst_39 = arith.constant dense<0.000000e+00> : vector<8xf32>
    %71 = vector.multi_reduction <add>, %70, %cst_39 [1] : vector<8x8xf32> to vector<8xf32>
    %72 = vector.shape_cast %71 : vector<8xf32> to vector<8x1xf32>
    %73 = tpu.reciprocal %72 {approx = true} : vector<8x1xf32> -> vector<8x1xf32>
    %74 = vector.broadcast %73 : vector<8x1xf32> to vector<8x8xf32>
    %75 = arith.mulf %70, %74 : vector<8x8xf32>
    %cst_40 = arith.constant dense<0.000000e+00> : vector<8x8xf32>
    %76 = tpu.matmul %75, %59, %cst_40 {dimension_numbers = #tpu.dot_dimension_numbers<[1], [0], [0], [1], [0, 0, 1, 1], [], []>} : vector<8x8xf32>, vector<8x8xf32>, vector<8x8xf32> -> vector<8x8xf32>
    %c0_41 = arith.constant 0 : index
    %c8_42 = arith.constant 8 : index
    %77 = vector.load %arg23[%c0_41, %c8_42] : memref<8x32xf32, #tpu.memory_space<vmem>>, vector<8x8xf32>
    tpu.vector_store %arg23[%c0_41, %c8_42], %76 {strides = array<i32>} : memref<8x32xf32, #tpu.memory_space<vmem>>, vector<8x8xf32>,
    %c0_43 = arith.constant 0 : index
    %c16 = arith.constant 16 : index
    %78 = vector.load %arg22[%c0_43, %c16] : memref<8x96xf32, #tpu.memory_space<vmem>>, vector<8x8xf32>
    %c0_44 = arith.constant 0 : index
    %c48 = arith.constant 48 : index
    %79 = vector.load %arg22[%c0_44, %c48] : memref<8x96xf32, #tpu.memory_space<vmem>>, vector<8x8xf32>
    %c0_45 = arith.constant 0 : index
    %c80 = arith.constant 80 : index
    %80 = vector.load %arg22[%c0_45, %c80] : memref<8x96xf32, #tpu.memory_space<vmem>>, vector<8x8xf32>
    %81 = tpu.transpose %79, [1, 0] : vector<8x8xf32> -> vector<8x8xf32>
    %cst_46 = arith.constant dense<0.000000e+00> : vector<8x8xf32>
    %82 = tpu.matmul %78, %81, %cst_46 {dimension_numbers = #tpu.dot_dimension_numbers<[1], [0], [0], [1], [0, 0, 1, 1], [], []>} : vector<8x8xf32>, vector<8x8xf32>, vector<8x8xf32> -> vector<8x8xf32>
    %cst_47 = arith.constant 0.353553385 : f32
    %83 = vector.broadcast %cst_47 : f32 to vector<8x8xf32>
    %84 = arith.mulf %82, %83 : vector<8x8xf32>
    %85 = vector.broadcast %1 : vector<1x8xf32> to vector<8x8xf32>
    %86 = arith.addf %84, %85 : vector<8x8xf32>
    %cst_48 = arith.constant dense<0xFF800000> : vector<8xf32>
    %87 = vector.multi_reduction <maximumf>, %86, %cst_48 [1] : vector<8x8xf32> to vector<8xf32>
    %88 = vector.shape_cast %87 : vector<8xf32> to vector<8x1xf32>
    %89 = vector.broadcast %88 : vector<8x1xf32> to vector<8x8xf32>
    %90 = arith.subf %86, %89 : vector<8x8xf32>
    %91 = math.exp %90 : vector<8x8xf32>
    %cst_49 = arith.constant dense<0.000000e+00> : vector<8xf32>
    %92 = vector.multi_reduction <add>, %91, %cst_49 [1] : vector<8x8xf32> to vector<8xf32>
    %93 = vector.shape_cast %92 : vector<8xf32> to vector<8x1xf32>
    %94 = tpu.reciprocal %93 {approx = true} : vector<8x1xf32> -> vector<8x1xf32>
    %95 = vector.broadcast %94 : vector<8x1xf32> to vector<8x8xf32>
    %96 = arith.mulf %91, %95 : vector<8x8xf32>
    %cst_50 = arith.constant dense<0.000000e+00> : vector<8x8xf32>
    %97 = tpu.matmul %96, %80, %cst_50 {dimension_numbers = #tpu.dot_dimension_numbers<[1], [0], [0], [1], [0, 0, 1, 1], [], []>} : vector<8x8xf32>, vector<8x8xf32>, vector<8x8xf32> -> vector<8x8xf32>
    %c0_51 = arith.constant 0 : index
    %c16_52 = arith.constant 16 : index
    %98 = vector.load %arg23[%c0_51, %c16_52] : memref<8x32xf32, #tpu.memory_space<vmem>>, vector<8x8xf32>
    tpu.vector_store %arg23[%c0_51, %c16_52], %97 {strides = array<i32>} : memref<8x32xf32, #tpu.memory_space<vmem>>, vector<8x8xf32>,
    %c0_53 = arith.constant 0 : index
    %c24 = arith.constant 24 : index
    %99 = vector.load %arg22[%c0_53, %c24] : memref<8x96xf32, #tpu.memory_space<vmem>>, vector<8x8xf32>
    %c0_54 = arith.constant 0 : index
    %c56 = arith.constant 56 : index
    %100 = vector.load %arg22[%c0_54, %c56] : memref<8x96xf32, #tpu.memory_space<vmem>>, vector<8x8xf32>
    %c0_55 = arith.constant 0 : index
    %c88 = arith.constant 88 : index
    %101 = vector.load %arg22[%c0_55, %c88] : memref<8x96xf32, #tpu.memory_space<vmem>>, vector<8x8xf32>
    %102 = tpu.transpose %100, [1, 0] : vector<8x8xf32> -> vector<8x8xf32>
    %cst_56 = arith.constant dense<0.000000e+00> : vector<8x8xf32>
    %103 = tpu.matmul %99, %102, %cst_56 {dimension_numbers = #tpu.dot_dimension_numbers<[1], [0], [0], [1], [0, 0, 1, 1], [], []>} : vector<8x8xf32>, vector<8x8xf32>, vector<8x8xf32> -> vector<8x8xf32>
    %cst_57 = arith.constant 0.353553385 : f32
    %104 = vector.broadcast %cst_57 : f32 to vector<8x8xf32>
    %105 = arith.mulf %103, %104 : vector<8x8xf32>
    %106 = vector.broadcast %1 : vector<1x8xf32> to vector<8x8xf32>
    %107 = arith.addf %105, %106 : vector<8x8xf32>
    %cst_58 = arith.constant dense<0xFF800000> : vector<8xf32>
    %108 = vector.multi_reduction <maximumf>, %107, %cst_58 [1] : vector<8x8xf32> to vector<8xf32>
    %109 = vector.shape_cast %108 : vector<8xf32> to vector<8x1xf32>
    %110 = vector.broadcast %109 : vector<8x1xf32> to vector<8x8xf32>
    %111 = arith.subf %107, %110 : vector<8x8xf32>
    %112 = math.exp %111 : vector<8x8xf32>
    %cst_59 = arith.constant dense<0.000000e+00> : vector<8xf32>
    %113 = vector.multi_reduction <add>, %112, %cst_59 [1] : vector<8x8xf32> to vector<8xf32>
    %114 = vector.shape_cast %113 : vector<8xf32> to vector<8x1xf32>
    %115 = tpu.reciprocal %114 {approx = true} : vector<8x1xf32> -> vector<8x1xf32>
    %116 = vector.broadcast %115 : vector<8x1xf32> to vector<8x8xf32>
    %117 = arith.mulf %112, %116 : vector<8x8xf32>
    %cst_60 = arith.constant dense<0.000000e+00> : vector<8x8xf32>
    %118 = tpu.matmul %117, %101, %cst_60 {dimension_numbers = #tpu.dot_dimension_numbers<[1], [0], [0], [1], [0, 0, 1, 1], [], []>} : vector<8x8xf32>, vector<8x8xf32>, vector<8x8xf32> -> vector<8x8xf32>
    %c0_61 = arith.constant 0 : index
    %c24_62 = arith.constant 24 : index
    %119 = vector.load %arg23[%c0_61, %c24_62] : memref<8x32xf32, #tpu.memory_space<vmem>>, vector<8x8xf32>
    tpu.vector_store %arg23[%c0_61, %c24_62], %118 {strides = array<i32>} : memref<8x32xf32, #tpu.memory_space<vmem>>, vector<8x8xf32>,
    %c0_63 = arith.constant 0 : index
    %c0_64 = arith.constant 0 : index
    %120 = vector.load %arg23[%c0_63, %c0_64] : memref<8x32xf32, #tpu.memory_space<vmem>>, vector<8x32xf32>
    %c0_65 = arith.constant 0 : index
    %c0_66 = arith.constant 0 : index
    %c0_67 = arith.constant 0 : index
    %121 = vector.load %arg7[%c0_65, %c0_66, %c0_67] : memref<2x32x32xf32, #tpu.memory_space<vmem>>, vector<1x32x32xf32>
    %122 = vector.shape_cast %121 : vector<1x32x32xf32> to vector<32x32xf32>
    %cst_68 = arith.constant dense<0.000000e+00> : vector<8x32xf32>
    %123 = tpu.matmul %120, %122, %cst_68 {dimension_numbers = #tpu.dot_dimension_numbers<[1], [0], [0], [1], [0, 0, 1, 1], [], []>} : vector<8x32xf32>, vector<32x32xf32>, vector<8x32xf32> -> vector<8x32xf32>
    %c0_69 = arith.constant 0 : index
    %c0_70 = arith.constant 0 : index
    %c0_71 = arith.constant 0 : index
    %124 = vector.load %arg8[%c0_69, %c0_70, %c0_71] : memref<2x1x32xf32, #tpu.memory_space<vmem>>, vector<1x1x32xf32>
    %125 = vector.shape_cast %124 : vector<1x1x32xf32> to vector<1x32xf32>
    %126 = vector.broadcast %125 : vector<1x32xf32> to vector<8x32xf32>
    %127 = arith.addf %123, %126 : vector<8x32xf32>
    %128 = arith.addf %127, %27 : vector<8x32xf32>
    %c0_72 = arith.constant 0 : index
    %c0_73 = arith.constant 0 : index
    %c0_74 = arith.constant 0 : index
    %129 = vector.load %arg9[%c0_72, %c0_73, %c0_74] : memref<2x1x32xf32, #tpu.memory_space<vmem>>, vector<1x1x32xf32>
    %130 = vector.shape_cast %129 : vector<1x1x32xf32> to vector<1x32xf32>
    %c0_75 = arith.constant 0 : index
    %c0_76 = arith.constant 0 : index
    %c0_77 = arith.constant 0 : index
    %131 = vector.load %arg10[%c0_75, %c0_76, %c0_77] : memref<2x1x32xf32, #tpu.memory_space<vmem>>, vector<1x1x32xf32>
    %132 = vector.shape_cast %131 : vector<1x1x32xf32> to vector<1x32xf32>
    %cst_78 = arith.constant dense<0.000000e+00> : vector<8xf32>
    %133 = vector.multi_reduction <add>, %128, %cst_78 [1] : vector<8x32xf32> to vector<8xf32>
    %134 = vector.shape_cast %133 : vector<8xf32> to vector<8x1xf32>
    %cst_79 = arith.constant 3.200000e+01 : f32
    %135 = vector.broadcast %cst_79 : f32 to vector<8x1xf32>
    %136 = arith.divf %134, %135 : vector<8x1xf32>
    %137 = vector.broadcast %136 : vector<8x1xf32> to vector<8x32xf32>
    %138 = arith.subf %128, %137 : vector<8x32xf32>
    %139 = arith.mulf %138, %138 : vector<8x32xf32>
    %cst_80 = arith.constant dense<0.000000e+00> : vector<8xf32>
    %140 = vector.multi_reduction <add>, %139, %cst_80 [1] : vector<8x32xf32> to vector<8xf32>
    %141 = vector.shape_cast %140 : vector<8xf32> to vector<8x1xf32>
    %cst_81 = arith.constant 3.200000e+01 : f32
    %142 = vector.broadcast %cst_81 : f32 to vector<8x1xf32>
    %143 = arith.divf %141, %142 : vector<8x1xf32>
    %144 = vector.broadcast %136 : vector<8x1xf32> to vector<8x32xf32>
    %145 = arith.subf %128, %144 : vector<8x32xf32>
    %cst_82 = arith.constant 9.99999974E-6 : f32
    %146 = vector.broadcast %cst_82 : f32 to vector<8x1xf32>
    %147 = arith.addf %143, %146 : vector<8x1xf32>
    %148 = math.rsqrt %147 : vector<8x1xf32>
    %149 = vector.broadcast %148 : vector<8x1xf32> to vector<8x32xf32>
    %150 = arith.mulf %145, %149 : vector<8x32xf32>
    %151 = vector.broadcast %130 : vector<1x32xf32> to vector<8x32xf32>
    %152 = arith.mulf %150, %151 : vector<8x32xf32>
    %153 = vector.broadcast %132 : vector<1x32xf32> to vector<8x32xf32>
    %154 = arith.addf %152, %153 : vector<8x32xf32>
    %c0_83 = arith.constant 0 : index
    %c0_84 = arith.constant 0 : index
    %c0_85 = arith.constant 0 : index
    %155 = vector.load %arg11[%c0_83, %c0_84, %c0_85] : memref<2x32x64xf32, #tpu.memory_space<vmem>>, vector<1x32x64xf32>
    %156 = vector.shape_cast %155 : vector<1x32x64xf32> to vector<32x64xf32>
    %cst_86 = arith.constant dense<0.000000e+00> : vector<8x64xf32>
    %157 = tpu.matmul %154, %156, %cst_86 {dimension_numbers = #tpu.dot_dimension_numbers<[1], [0], [0], [1], [0, 0, 1, 1], [], []>} : vector<8x32xf32>, vector<32x64xf32>, vector<8x64xf32> -> vector<8x64xf32>
    %c0_87 = arith.constant 0 : index
    %c0_88 = arith.constant 0 : index
    %c0_89 = arith.constant 0 : index
    %158 = vector.load %arg12[%c0_87, %c0_88, %c0_89] : memref<2x1x64xf32, #tpu.memory_space<vmem>>, vector<1x1x64xf32>
    %159 = vector.shape_cast %158 : vector<1x1x64xf32> to vector<1x64xf32>
    %160 = vector.broadcast %159 : vector<1x64xf32> to vector<8x64xf32>
    %161 = arith.addf %157, %160 : vector<8x64xf32>
    %cst_90 = arith.constant 5.000000e-01 : f32
    %162 = vector.broadcast %cst_90 : f32 to vector<8x64xf32>
    %163 = arith.mulf %162, %161 : vector<8x64xf32>
    %cst_91 = arith.constant 0.707106769 : f32
    %164 = vector.broadcast %cst_91 : f32 to vector<8x64xf32>
    %165 = arith.mulf %161, %164 : vector<8x64xf32>
    %166 = math.erf %165 : vector<8x64xf32>
    %cst_92 = arith.constant 1.000000e+00 : f32
    %167 = vector.broadcast %cst_92 : f32 to vector<8x64xf32>
    %168 = arith.addf %167, %166 : vector<8x64xf32>
    %169 = arith.mulf %163, %168 : vector<8x64xf32>
    %c0_93 = arith.constant 0 : index
    %c0_94 = arith.constant 0 : index
    %c0_95 = arith.constant 0 : index
    %170 = vector.load %arg13[%c0_93, %c0_94, %c0_95] : memref<2x64x32xf32, #tpu.memory_space<vmem>>, vector<1x64x32xf32>
    %171 = vector.shape_cast %170 : vector<1x64x32xf32> to vector<64x32xf32>
    %cst_96 = arith.constant dense<0.000000e+00> : vector<8x32xf32>
    %172 = tpu.matmul %169, %171, %cst_96 {dimension_numbers = #tpu.dot_dimension_numbers<[1], [0], [0], [1], [0, 0, 1, 1], [], []>} : vector<8x64xf32>, vector<64x32xf32>, vector<8x32xf32> -> vector<8x32xf32>
    %c0_97 = arith.constant 0 : index
    %c0_98 = arith.constant 0 : index
    %c0_99 = arith.constant 0 : index
    %173 = vector.load %arg14[%c0_97, %c0_98, %c0_99] : memref<2x1x32xf32, #tpu.memory_space<vmem>>, vector<1x1x32xf32>
    %174 = vector.shape_cast %173 : vector<1x1x32xf32> to vector<1x32xf32>
    %175 = vector.broadcast %174 : vector<1x32xf32> to vector<8x32xf32>
    %176 = arith.addf %172, %175 : vector<8x32xf32>
    %177 = arith.addf %176, %154 : vector<8x32xf32>
    %c0_100 = arith.constant 0 : index
    %c0_101 = arith.constant 0 : index
    %c0_102 = arith.constant 0 : index
    %178 = vector.load %arg15[%c0_100, %c0_101, %c0_102] : memref<2x1x32xf32, #tpu.memory_space<vmem>>, vector<1x1x32xf32>
    %179 = vector.shape_cast %178 : vector<1x1x32xf32> to vector<1x32xf32>
    %c0_103 = arith.constant 0 : index
    %c0_104 = arith.constant 0 : index
    %c0_105 = arith.constant 0 : index
    %180 = vector.load %arg16[%c0_103, %c0_104, %c0_105] : memref<2x1x32xf32, #tpu.memory_space<vmem>>, vector<1x1x32xf32>
    %181 = vector.shape_cast %180 : vector<1x1x32xf32> to vector<1x32xf32>
    %cst_106 = arith.constant dense<0.000000e+00> : vector<8xf32>
    %182 = vector.multi_reduction <add>, %177, %cst_106 [1] : vector<8x32xf32> to vector<8xf32>
    %183 = vector.shape_cast %182 : vector<8xf32> to vector<8x1xf32>
    %cst_107 = arith.constant 3.200000e+01 : f32
    %184 = vector.broadcast %cst_107 : f32 to vector<8x1xf32>
    %185 = arith.divf %183, %184 : vector<8x1xf32>
    %186 = vector.broadcast %185 : vector<8x1xf32> to vector<8x32xf32>
    %187 = arith.subf %177, %186 : vector<8x32xf32>
    %188 = arith.mulf %187, %187 : vector<8x32xf32>
    %cst_108 = arith.constant dense<0.000000e+00> : vector<8xf32>
    %189 = vector.multi_reduction <add>, %188, %cst_108 [1] : vector<8x32xf32> to vector<8xf32>
    %190 = vector.shape_cast %189 : vector<8xf32> to vector<8x1xf32>
    %cst_109 = arith.constant 3.200000e+01 : f32
    %191 = vector.broadcast %cst_109 : f32 to vector<8x1xf32>
    %192 = arith.divf %190, %191 : vector<8x1xf32>
    %193 = vector.broadcast %185 : vector<8x1xf32> to vector<8x32xf32>
    %194 = arith.subf %177, %193 : vector<8x32xf32>
    %cst_110 = arith.constant 9.99999974E-6 : f32
    %195 = vector.broadcast %cst_110 : f32 to vector<8x1xf32>
    %196 = arith.addf %192, %195 : vector<8x1xf32>
    %197 = math.rsqrt %196 : vector<8x1xf32>
    %198 = vector.broadcast %197 : vector<8x1xf32> to vector<8x32xf32>
    %199 = arith.mulf %194, %198 : vector<8x32xf32>
    %200 = vector.broadcast %179 : vector<1x32xf32> to vector<8x32xf32>
    %201 = arith.mulf %199, %200 : vector<8x32xf32>
    %202 = vector.broadcast %181 : vector<1x32xf32> to vector<8x32xf32>
    %203 = arith.addf %201, %202 : vector<8x32xf32>
    %c1 = arith.constant 1 : index
    %c0_111 = arith.constant 0 : index
    %c0_112 = arith.constant 0 : index
    %204 = vector.load %arg5[%c1, %c0_111, %c0_112] : memref<2x32x96xf32, #tpu.memory_space<vmem>>, vector<1x32x96xf32>
    %205 = vector.shape_cast %204 : vector<1x32x96xf32> to vector<32x96xf32>
    %cst_113 = arith.constant dense<0.000000e+00> : vector<8x96xf32>
    %206 = tpu.matmul %203, %205, %cst_113 {dimension_numbers = #tpu.dot_dimension_numbers<[1], [0], [0], [1], [0, 0, 1, 1], [], []>} : vector<8x32xf32>, vector<32x96xf32>, vector<8x96xf32> -> vector<8x96xf32>
    %c1_114 = arith.constant 1 : index
    %c0_115 = arith.constant 0 : index
    %c0_116 = arith.constant 0 : index
    %207 = vector.load %arg6[%c1_114, %c0_115, %c0_116] : memref<2x1x96xf32, #tpu.memory_space<vmem>>, vector<1x1x96xf32>
    %208 = vector.shape_cast %207 : vector<1x1x96xf32> to vector<1x96xf32>
    %209 = vector.broadcast %208 : vector<1x96xf32> to vector<8x96xf32>
    %210 = arith.addf %206, %209 : vector<8x96xf32>
    %c0_117 = arith.constant 0 : index
    %c0_118 = arith.constant 0 : index
    %211 = vector.load %arg22[%c0_117, %c0_118] : memref<8x96xf32, #tpu.memory_space<vmem>>, vector<8x96xf32>
    tpu.vector_store %arg22[%c0_117, %c0_118], %210 {strides = array<i32>} : memref<8x96xf32, #tpu.memory_space<vmem>>, vector<8x96xf32>,
    %c0_119 = arith.constant 0 : index
    %c0_120 = arith.constant 0 : index
    %212 = vector.load %arg22[%c0_119, %c0_120] : memref<8x96xf32, #tpu.memory_space<vmem>>, vector<8x8xf32>
    %c0_121 = arith.constant 0 : index
    %c32_122 = arith.constant 32 : index
    %213 = vector.load %arg22[%c0_121, %c32_122] : memref<8x96xf32, #tpu.memory_space<vmem>>, vector<8x8xf32>
    %c0_123 = arith.constant 0 : index
    %c64_124 = arith.constant 64 : index
    %214 = vector.load %arg22[%c0_123, %c64_124] : memref<8x96xf32, #tpu.memory_space<vmem>>, vector<8x8xf32>
    %215 = tpu.transpose %213, [1, 0] : vector<8x8xf32> -> vector<8x8xf32>
    %cst_125 = arith.constant dense<0.000000e+00> : vector<8x8xf32>
    %216 = tpu.matmul %212, %215, %cst_125 {dimension_numbers = #tpu.dot_dimension_numbers<[1], [0], [0], [1], [0, 0, 1, 1], [], []>} : vector<8x8xf32>, vector<8x8xf32>, vector<8x8xf32> -> vector<8x8xf32>
    %cst_126 = arith.constant 0.353553385 : f32
    %217 = vector.broadcast %cst_126 : f32 to vector<8x8xf32>
    %218 = arith.mulf %216, %217 : vector<8x8xf32>
    %219 = vector.broadcast %1 : vector<1x8xf32> to vector<8x8xf32>
    %220 = arith.addf %218, %219 : vector<8x8xf32>
    %cst_127 = arith.constant dense<0xFF800000> : vector<8xf32>
    %221 = vector.multi_reduction <maximumf>, %220, %cst_127 [1] : vector<8x8xf32> to vector<8xf32>
    %222 = vector.shape_cast %221 : vector<8xf32> to vector<8x1xf32>
    %223 = vector.broadcast %222 : vector<8x1xf32> to vector<8x8xf32>
    %224 = arith.subf %220, %223 : vector<8x8xf32>
    %225 = math.exp %224 : vector<8x8xf32>
    %cst_128 = arith.constant dense<0.000000e+00> : vector<8xf32>
    %226 = vector.multi_reduction <add>, %225, %cst_128 [1] : vector<8x8xf32> to vector<8xf32>
    %227 = vector.shape_cast %226 : vector<8xf32> to vector<8x1xf32>
    %228 = tpu.reciprocal %227 {approx = true} : vector<8x1xf32> -> vector<8x1xf32>
    %229 = vector.broadcast %228 : vector<8x1xf32> to vector<8x8xf32>
    %230 = arith.mulf %225, %229 : vector<8x8xf32>
    %cst_129 = arith.constant dense<0.000000e+00> : vector<8x8xf32>
    %231 = tpu.matmul %230, %214, %cst_129 {dimension_numbers = #tpu.dot_dimension_numbers<[1], [0], [0], [1], [0, 0, 1, 1], [], []>} : vector<8x8xf32>, vector<8x8xf32>, vector<8x8xf32> -> vector<8x8xf32>
    %c0_130 = arith.constant 0 : index
    %c0_131 = arith.constant 0 : index
    %232 = vector.load %arg23[%c0_130, %c0_131] : memref<8x32xf32, #tpu.memory_space<vmem>>, vector<8x8xf32>
    tpu.vector_store %arg23[%c0_130, %c0_131], %231 {strides = array<i32>} : memref<8x32xf32, #tpu.memory_space<vmem>>, vector<8x8xf32>,
    %c0_132 = arith.constant 0 : index
    %c8_133 = arith.constant 8 : index
    %233 = vector.load %arg22[%c0_132, %c8_133] : memref<8x96xf32, #tpu.memory_space<vmem>>, vector<8x8xf32>
    %c0_134 = arith.constant 0 : index
    %c40_135 = arith.constant 40 : index
    %234 = vector.load %arg22[%c0_134, %c40_135] : memref<8x96xf32, #tpu.memory_space<vmem>>, vector<8x8xf32>
    %c0_136 = arith.constant 0 : index
    %c72_137 = arith.constant 72 : index
    %235 = vector.load %arg22[%c0_136, %c72_137] : memref<8x96xf32, #tpu.memory_space<vmem>>, vector<8x8xf32>
    %236 = tpu.transpose %234, [1, 0] : vector<8x8xf32> -> vector<8x8xf32>
    %cst_138 = arith.constant dense<0.000000e+00> : vector<8x8xf32>
    %237 = tpu.matmul %233, %236, %cst_138 {dimension_numbers = #tpu.dot_dimension_numbers<[1], [0], [0], [1], [0, 0, 1, 1], [], []>} : vector<8x8xf32>, vector<8x8xf32>, vector<8x8xf32> -> vector<8x8xf32>
    %cst_139 = arith.constant 0.353553385 : f32
    %238 = vector.broadcast %cst_139 : f32 to vector<8x8xf32>
    %239 = arith.mulf %237, %238 : vector<8x8xf32>
    %240 = vector.broadcast %1 : vector<1x8xf32> to vector<8x8xf32>
    %241 = arith.addf %239, %240 : vector<8x8xf32>
    %cst_140 = arith.constant dense<0xFF800000> : vector<8xf32>
    %242 = vector.multi_reduction <maximumf>, %241, %cst_140 [1] : vector<8x8xf32> to vector<8xf32>
    %243 = vector.shape_cast %242 : vector<8xf32> to vector<8x1xf32>
    %244 = vector.broadcast %243 : vector<8x1xf32> to vector<8x8xf32>
    %245 = arith.subf %241, %244 : vector<8x8xf32>
    %246 = math.exp %245 : vector<8x8xf32>
    %cst_141 = arith.constant dense<0.000000e+00> : vector<8xf32>
    %247 = vector.multi_reduction <add>, %246, %cst_141 [1] : vector<8x8xf32> to vector<8xf32>
    %248 = vector.shape_cast %247 : vector<8xf32> to vector<8x1xf32>
    %249 = tpu.reciprocal %248 {approx = true} : vector<8x1xf32> -> vector<8x1xf32>
    %250 = vector.broadcast %249 : vector<8x1xf32> to vector<8x8xf32>
    %251 = arith.mulf %246, %250 : vector<8x8xf32>
    %cst_142 = arith.constant dense<0.000000e+00> : vector<8x8xf32>
    %252 = tpu.matmul %251, %235, %cst_142 {dimension_numbers = #tpu.dot_dimension_numbers<[1], [0], [0], [1], [0, 0, 1, 1], [], []>} : vector<8x8xf32>, vector<8x8xf32>, vector<8x8xf32> -> vector<8x8xf32>
    %c0_143 = arith.constant 0 : index
    %c8_144 = arith.constant 8 : index
    %253 = vector.load %arg23[%c0_143, %c8_144] : memref<8x32xf32, #tpu.memory_space<vmem>>, vector<8x8xf32>
    tpu.vector_store %arg23[%c0_143, %c8_144], %252 {strides = array<i32>} : memref<8x32xf32, #tpu.memory_space<vmem>>, vector<8x8xf32>,
    %c0_145 = arith.constant 0 : index
    %c16_146 = arith.constant 16 : index
    %254 = vector.load %arg22[%c0_145, %c16_146] : memref<8x96xf32, #tpu.memory_space<vmem>>, vector<8x8xf32>
    %c0_147 = arith.constant 0 : index
    %c48_148 = arith.constant 48 : index
    %255 = vector.load %arg22[%c0_147, %c48_148] : memref<8x96xf32, #tpu.memory_space<vmem>>, vector<8x8xf32>
    %c0_149 = arith.constant 0 : index
    %c80_150 = arith.constant 80 : index
    %256 = vector.load %arg22[%c0_149, %c80_150] : memref<8x96xf32, #tpu.memory_space<vmem>>, vector<8x8xf32>
    %257 = tpu.transpose %255, [1, 0] : vector<8x8xf32> -> vector<8x8xf32>
    %cst_151 = arith.constant dense<0.000000e+00> : vector<8x8xf32>
    %258 = tpu.matmul %254, %257, %cst_151 {dimension_numbers = #tpu.dot_dimension_numbers<[1], [0], [0], [1], [0, 0, 1, 1], [], []>} : vector<8x8xf32>, vector<8x8xf32>, vector<8x8xf32> -> vector<8x8xf32>
    %cst_152 = arith.constant 0.353553385 : f32
    %259 = vector.broadcast %cst_152 : f32 to vector<8x8xf32>
    %260 = arith.mulf %258, %259 : vector<8x8xf32>
    %261 = vector.broadcast %1 : vector<1x8xf32> to vector<8x8xf32>
    %262 = arith.addf %260, %261 : vector<8x8xf32>
    %cst_153 = arith.constant dense<0xFF800000> : vector<8xf32>
    %263 = vector.multi_reduction <maximumf>, %262, %cst_153 [1] : vector<8x8xf32> to vector<8xf32>
    %264 = vector.shape_cast %263 : vector<8xf32> to vector<8x1xf32>
    %265 = vector.broadcast %264 : vector<8x1xf32> to vector<8x8xf32>
    %266 = arith.subf %262, %265 : vector<8x8xf32>
    %267 = math.exp %266 : vector<8x8xf32>
    %cst_154 = arith.constant dense<0.000000e+00> : vector<8xf32>
    %268 = vector.multi_reduction <add>, %267, %cst_154 [1] : vector<8x8xf32> to vector<8xf32>
    %269 = vector.shape_cast %268 : vector<8xf32> to vector<8x1xf32>
    %270 = tpu.reciprocal %269 {approx = true} : vector<8x1xf32> -> vector<8x1xf32>
    %271 = vector.broadcast %270 : vector<8x1xf32> to vector<8x8xf32>
    %272 = arith.mulf %267, %271 : vector<8x8xf32>
    %cst_155 = arith.constant dense<0.000000e+00> : vector<8x8xf32>
    %273 = tpu.matmul %272, %256, %cst_155 {dimension_numbers = #tpu.dot_dimension_numbers<[1], [0], [0], [1], [0, 0, 1, 1], [], []>} : vector<8x8xf32>, vector<8x8xf32>, vector<8x8xf32> -> vector<8x8xf32>
    %c0_156 = arith.constant 0 : index
    %c16_157 = arith.constant 16 : index
    %274 = vector.load %arg23[%c0_156, %c16_157] : memref<8x32xf32, #tpu.memory_space<vmem>>, vector<8x8xf32>
    tpu.vector_store %arg23[%c0_156, %c16_157], %273 {strides = array<i32>} : memref<8x32xf32, #tpu.memory_space<vmem>>, vector<8x8xf32>,
    %c0_158 = arith.constant 0 : index
    %c24_159 = arith.constant 24 : index
    %275 = vector.load %arg22[%c0_158, %c24_159] : memref<8x96xf32, #tpu.memory_space<vmem>>, vector<8x8xf32>
    %c0_160 = arith.constant 0 : index
    %c56_161 = arith.constant 56 : index
    %276 = vector.load %arg22[%c0_160, %c56_161] : memref<8x96xf32, #tpu.memory_space<vmem>>, vector<8x8xf32>
    %c0_162 = arith.constant 0 : index
    %c88_163 = arith.constant 88 : index
    %277 = vector.load %arg22[%c0_162, %c88_163] : memref<8x96xf32, #tpu.memory_space<vmem>>, vector<8x8xf32>
    %278 = tpu.transpose %276, [1, 0] : vector<8x8xf32> -> vector<8x8xf32>
    %cst_164 = arith.constant dense<0.000000e+00> : vector<8x8xf32>
    %279 = tpu.matmul %275, %278, %cst_164 {dimension_numbers = #tpu.dot_dimension_numbers<[1], [0], [0], [1], [0, 0, 1, 1], [], []>} : vector<8x8xf32>, vector<8x8xf32>, vector<8x8xf32> -> vector<8x8xf32>
    %cst_165 = arith.constant 0.353553385 : f32
    %280 = vector.broadcast %cst_165 : f32 to vector<8x8xf32>
    %281 = arith.mulf %279, %280 : vector<8x8xf32>
    %282 = vector.broadcast %1 : vector<1x8xf32> to vector<8x8xf32>
    %283 = arith.addf %281, %282 : vector<8x8xf32>
    %cst_166 = arith.constant dense<0xFF800000> : vector<8xf32>
    %284 = vector.multi_reduction <maximumf>, %283, %cst_166 [1] : vector<8x8xf32> to vector<8xf32>
    %285 = vector.shape_cast %284 : vector<8xf32> to vector<8x1xf32>
    %286 = vector.broadcast %285 : vector<8x1xf32> to vector<8x8xf32>
    %287 = arith.subf %283, %286 : vector<8x8xf32>
    %288 = math.exp %287 : vector<8x8xf32>
    %cst_167 = arith.constant dense<0.000000e+00> : vector<8xf32>
    %289 = vector.multi_reduction <add>, %288, %cst_167 [1] : vector<8x8xf32> to vector<8xf32>
    %290 = vector.shape_cast %289 : vector<8xf32> to vector<8x1xf32>
    %291 = tpu.reciprocal %290 {approx = true} : vector<8x1xf32> -> vector<8x1xf32>
    %292 = vector.broadcast %291 : vector<8x1xf32> to vector<8x8xf32>
    %293 = arith.mulf %288, %292 : vector<8x8xf32>
    %cst_168 = arith.constant dense<0.000000e+00> : vector<8x8xf32>
    %294 = tpu.matmul %293, %277, %cst_168 {dimension_numbers = #tpu.dot_dimension_numbers<[1], [0], [0], [1], [0, 0, 1, 1], [], []>} : vector<8x8xf32>, vector<8x8xf32>, vector<8x8xf32> -> vector<8x8xf32>
    %c0_169 = arith.constant 0 : index
    %c24_170 = arith.constant 24 : index
    %295 = vector.load %arg23[%c0_169, %c24_170] : memref<8x32xf32, #tpu.memory_space<vmem>>, vector<8x8xf32>
    tpu.vector_store %arg23[%c0_169, %c24_170], %294 {strides = array<i32>} : memref<8x32xf32, #tpu.memory_space<vmem>>, vector<8x8xf32>,
    %c0_171 = arith.constant 0 : index
    %c0_172 = arith.constant 0 : index
    %296 = vector.load %arg23[%c0_171, %c0_172] : memref<8x32xf32, #tpu.memory_space<vmem>>, vector<8x32xf32>
    %c1_173 = arith.constant 1 : index
    %c0_174 = arith.constant 0 : index
    %c0_175 = arith.constant 0 : index
    %297 = vector.load %arg7[%c1_173, %c0_174, %c0_175] : memref<2x32x32xf32, #tpu.memory_space<vmem>>, vector<1x32x32xf32>
    %298 = vector.shape_cast %297 : vector<1x32x32xf32> to vector<32x32xf32>
    %cst_176 = arith.constant dense<0.000000e+00> : vector<8x32xf32>
    %299 = tpu.matmul %296, %298, %cst_176 {dimension_numbers = #tpu.dot_dimension_numbers<[1], [0], [0], [1], [0, 0, 1, 1], [], []>} : vector<8x32xf32>, vector<32x32xf32>, vector<8x32xf32> -> vector<8x32xf32>
    %c1_177 = arith.constant 1 : index
    %c0_178 = arith.constant 0 : index
    %c0_179 = arith.constant 0 : index
    %300 = vector.load %arg8[%c1_177, %c0_178, %c0_179] : memref<2x1x32xf32, #tpu.memory_space<vmem>>, vector<1x1x32xf32>
    %301 = vector.shape_cast %300 : vector<1x1x32xf32> to vector<1x32xf32>
    %302 = vector.broadcast %301 : vector<1x32xf32> to vector<8x32xf32>
    %303 = arith.addf %299, %302 : vector<8x32xf32>
    %304 = arith.addf %303, %203 : vector<8x32xf32>
    %c1_180 = arith.constant 1 : index
    %c0_181 = arith.constant 0 : index
    %c0_182 = arith.constant 0 : index
    %305 = vector.load %arg9[%c1_180, %c0_181, %c0_182] : memref<2x1x32xf32, #tpu.memory_space<vmem>>, vector<1x1x32xf32>
    %306 = vector.shape_cast %305 : vector<1x1x32xf32> to vector<1x32xf32>
    %c1_183 = arith.constant 1 : index
    %c0_184 = arith.constant 0 : index
    %c0_185 = arith.constant 0 : index
    %307 = vector.load %arg10[%c1_183, %c0_184, %c0_185] : memref<2x1x32xf32, #tpu.memory_space<vmem>>, vector<1x1x32xf32>
    %308 = vector.shape_cast %307 : vector<1x1x32xf32> to vector<1x32xf32>
    %cst_186 = arith.constant dense<0.000000e+00> : vector<8xf32>
    %309 = vector.multi_reduction <add>, %304, %cst_186 [1] : vector<8x32xf32> to vector<8xf32>
    %310 = vector.shape_cast %309 : vector<8xf32> to vector<8x1xf32>
    %cst_187 = arith.constant 3.200000e+01 : f32
    %311 = vector.broadcast %cst_187 : f32 to vector<8x1xf32>
    %312 = arith.divf %310, %311 : vector<8x1xf32>
    %313 = vector.broadcast %312 : vector<8x1xf32> to vector<8x32xf32>
    %314 = arith.subf %304, %313 : vector<8x32xf32>
    %315 = arith.mulf %314, %314 : vector<8x32xf32>
    %cst_188 = arith.constant dense<0.000000e+00> : vector<8xf32>
    %316 = vector.multi_reduction <add>, %315, %cst_188 [1] : vector<8x32xf32> to vector<8xf32>
    %317 = vector.shape_cast %316 : vector<8xf32> to vector<8x1xf32>
    %cst_189 = arith.constant 3.200000e+01 : f32
    %318 = vector.broadcast %cst_189 : f32 to vector<8x1xf32>
    %319 = arith.divf %317, %318 : vector<8x1xf32>
    %320 = vector.broadcast %312 : vector<8x1xf32> to vector<8x32xf32>
    %321 = arith.subf %304, %320 : vector<8x32xf32>
    %cst_190 = arith.constant 9.99999974E-6 : f32
    %322 = vector.broadcast %cst_190 : f32 to vector<8x1xf32>
    %323 = arith.addf %319, %322 : vector<8x1xf32>
    %324 = math.rsqrt %323 : vector<8x1xf32>
    %325 = vector.broadcast %324 : vector<8x1xf32> to vector<8x32xf32>
    %326 = arith.mulf %321, %325 : vector<8x32xf32>
    %327 = vector.broadcast %306 : vector<1x32xf32> to vector<8x32xf32>
    %328 = arith.mulf %326, %327 : vector<8x32xf32>
    %329 = vector.broadcast %308 : vector<1x32xf32> to vector<8x32xf32>
    %330 = arith.addf %328, %329 : vector<8x32xf32>
    %c1_191 = arith.constant 1 : index
    %c0_192 = arith.constant 0 : index
    %c0_193 = arith.constant 0 : index
    %331 = vector.load %arg11[%c1_191, %c0_192, %c0_193] : memref<2x32x64xf32, #tpu.memory_space<vmem>>, vector<1x32x64xf32>
    %332 = vector.shape_cast %331 : vector<1x32x64xf32> to vector<32x64xf32>
    %cst_194 = arith.constant dense<0.000000e+00> : vector<8x64xf32>
    %333 = tpu.matmul %330, %332, %cst_194 {dimension_numbers = #tpu.dot_dimension_numbers<[1], [0], [0], [1], [0, 0, 1, 1], [], []>} : vector<8x32xf32>, vector<32x64xf32>, vector<8x64xf32> -> vector<8x64xf32>
    %c1_195 = arith.constant 1 : index
    %c0_196 = arith.constant 0 : index
    %c0_197 = arith.constant 0 : index
    %334 = vector.load %arg12[%c1_195, %c0_196, %c0_197] : memref<2x1x64xf32, #tpu.memory_space<vmem>>, vector<1x1x64xf32>
    %335 = vector.shape_cast %334 : vector<1x1x64xf32> to vector<1x64xf32>
    %336 = vector.broadcast %335 : vector<1x64xf32> to vector<8x64xf32>
    %337 = arith.addf %333, %336 : vector<8x64xf32>
    %cst_198 = arith.constant 5.000000e-01 : f32
    %338 = vector.broadcast %cst_198 : f32 to vector<8x64xf32>
    %339 = arith.mulf %338, %337 : vector<8x64xf32>
    %cst_199 = arith.constant 0.707106769 : f32
    %340 = vector.broadcast %cst_199 : f32 to vector<8x64xf32>
    %341 = arith.mulf %337, %340 : vector<8x64xf32>
    %342 = math.erf %341 : vector<8x64xf32>
    %cst_200 = arith.constant 1.000000e+00 : f32
    %343 = vector.broadcast %cst_200 : f32 to vector<8x64xf32>
    %344 = arith.addf %343, %342 : vector<8x64xf32>
    %345 = arith.mulf %339, %344 : vector<8x64xf32>
    %c1_201 = arith.constant 1 : index
    %c0_202 = arith.constant 0 : index
    %c0_203 = arith.constant 0 : index
    %346 = vector.load %arg13[%c1_201, %c0_202, %c0_203] : memref<2x64x32xf32, #tpu.memory_space<vmem>>, vector<1x64x32xf32>
    %347 = vector.shape_cast %346 : vector<1x64x32xf32> to vector<64x32xf32>
    %cst_204 = arith.constant dense<0.000000e+00> : vector<8x32xf32>
    %348 = tpu.matmul %345, %347, %cst_204 {dimension_numbers = #tpu.dot_dimension_numbers<[1], [0], [0], [1], [0, 0, 1, 1], [], []>} : vector<8x64xf32>, vector<64x32xf32>, vector<8x32xf32> -> vector<8x32xf32>
    %c1_205 = arith.constant 1 : index
    %c0_206 = arith.constant 0 : index
    %c0_207 = arith.constant 0 : index
    %349 = vector.load %arg14[%c1_205, %c0_206, %c0_207] : memref<2x1x32xf32, #tpu.memory_space<vmem>>, vector<1x1x32xf32>
    %350 = vector.shape_cast %349 : vector<1x1x32xf32> to vector<1x32xf32>
    %351 = vector.broadcast %350 : vector<1x32xf32> to vector<8x32xf32>
    %352 = arith.addf %348, %351 : vector<8x32xf32>
    %353 = arith.addf %352, %330 : vector<8x32xf32>
    %c1_208 = arith.constant 1 : index
    %c0_209 = arith.constant 0 : index
    %c0_210 = arith.constant 0 : index
    %354 = vector.load %arg15[%c1_208, %c0_209, %c0_210] : memref<2x1x32xf32, #tpu.memory_space<vmem>>, vector<1x1x32xf32>
    %355 = vector.shape_cast %354 : vector<1x1x32xf32> to vector<1x32xf32>
    %c1_211 = arith.constant 1 : index
    %c0_212 = arith.constant 0 : index
    %c0_213 = arith.constant 0 : index
    %356 = vector.load %arg16[%c1_211, %c0_212, %c0_213] : memref<2x1x32xf32, #tpu.memory_space<vmem>>, vector<1x1x32xf32>
    %357 = vector.shape_cast %356 : vector<1x1x32xf32> to vector<1x32xf32>
    %cst_214 = arith.constant dense<0.000000e+00> : vector<8xf32>
    %358 = vector.multi_reduction <add>, %353, %cst_214 [1] : vector<8x32xf32> to vector<8xf32>
    %359 = vector.shape_cast %358 : vector<8xf32> to vector<8x1xf32>
    %cst_215 = arith.constant 3.200000e+01 : f32
    %360 = vector.broadcast %cst_215 : f32 to vector<8x1xf32>
    %361 = arith.divf %359, %360 : vector<8x1xf32>
    %362 = vector.broadcast %361 : vector<8x1xf32> to vector<8x32xf32>
    %363 = arith.subf %353, %362 : vector<8x32xf32>
    %364 = arith.mulf %363, %363 : vector<8x32xf32>
    %cst_216 = arith.constant dense<0.000000e+00> : vector<8xf32>
    %365 = vector.multi_reduction <add>, %364, %cst_216 [1] : vector<8x32xf32> to vector<8xf32>
    %366 = vector.shape_cast %365 : vector<8xf32> to vector<8x1xf32>
    %cst_217 = arith.constant 3.200000e+01 : f32
    %367 = vector.broadcast %cst_217 : f32 to vector<8x1xf32>
    %368 = arith.divf %366, %367 : vector<8x1xf32>
    %369 = vector.broadcast %361 : vector<8x1xf32> to vector<8x32xf32>
    %370 = arith.subf %353, %369 : vector<8x32xf32>
    %cst_218 = arith.constant 9.99999974E-6 : f32
    %371 = vector.broadcast %cst_218 : f32 to vector<8x1xf32>
    %372 = arith.addf %368, %371 : vector<8x1xf32>
    %373 = math.rsqrt %372 : vector<8x1xf32>
    %374 = vector.broadcast %373 : vector<8x1xf32> to vector<8x32xf32>
    %375 = arith.mulf %370, %374 : vector<8x32xf32>
    %376 = vector.broadcast %355 : vector<1x32xf32> to vector<8x32xf32>
    %377 = arith.mulf %375, %376 : vector<8x32xf32>
    %378 = vector.broadcast %357 : vector<1x32xf32> to vector<8x32xf32>
    %379 = arith.addf %377, %378 : vector<8x32xf32>
    %380 = vector.extract_strided_slice %379 {offsets = [0, 0], sizes = [1, 32], strides = [1, 1]} : vector<8x32xf32> to vector<1x32xf32>
    %c0_219 = arith.constant 0 : index
    %c0_220 = arith.constant 0 : index
    %381 = vector.load %arg17[%c0_219, %c0_220] : memref<32x32xf32, #tpu.memory_space<vmem>>, vector<32x32xf32>
    %cst_221 = arith.constant dense<0.000000e+00> : vector<1x32xf32>
    %382 = tpu.matmul %380, %381, %cst_221 {dimension_numbers = #tpu.dot_dimension_numbers<[1], [0], [0], [1], [0, 0, 1, 1], [], []>} : vector<1x32xf32>, vector<32x32xf32>, vector<1x32xf32> -> vector<1x32xf32>
    %c0_222 = arith.constant 0 : index
    %c0_223 = arith.constant 0 : index
    %383 = vector.load %arg18[%c0_222, %c0_223] : memref<1x32xf32, #tpu.memory_space<vmem>>, vector<1x32xf32>
    %384 = arith.addf %382, %383 : vector<1x32xf32>
    %385 = math.tanh %384 : vector<1x32xf32>
    %c0_224 = arith.constant 0 : index
    %c0_225 = arith.constant 0 : index
    %386 = vector.load %arg19[%c0_224, %c0_225] : memref<32x6xf32, #tpu.memory_space<vmem>>, vector<32x6xf32>
    %cst_226 = arith.constant dense<0.000000e+00> : vector<1x6xf32>
    %387 = tpu.matmul %385, %386, %cst_226 {dimension_numbers = #tpu.dot_dimension_numbers<[1], [0], [0], [1], [0, 0, 1, 1], [], []>} : vector<1x32xf32>, vector<32x6xf32>, vector<1x6xf32> -> vector<1x6xf32>
    %c0_227 = arith.constant 0 : index
    %c0_228 = arith.constant 0 : index
    %388 = vector.load %arg20[%c0_227, %c0_228] : memref<1x6xf32, #tpu.memory_space<vmem>>, vector<1x6xf32>
    %389 = arith.addf %387, %388 : vector<1x6xf32>
    %c0_229 = arith.constant 0 : index
    %c0_230 = arith.constant 0 : index
    %c0_231 = arith.constant 0 : index
    %390 = vector.load %arg21[%c0_229, %c0_230, %c0_231] : memref<1x1x6xf32, #tpu.memory_space<vmem>>, vector<1x1x6xf32>
    %391 = vector.shape_cast %390 : vector<1x1x6xf32> to vector<1x6xf32>
    %392 = vector.shape_cast %389 : vector<1x6xf32> to vector<1x1x6xf32>
    tpu.vector_store %arg21[%c0_229, %c0_230, %c0_231], %392 {strides = array<i32>} : memref<1x1x6xf32, #tpu.memory_space<vmem>>, vector<1x1x6xf32>,
    return
  }
  func.func @transform_0(%arg0: i32) -> (i32, i32, i32) {
    %c0_i32 = arith.constant 0 : i32
    %c0_i32_0 = arith.constant 0 : i32
    %c0_i32_1 = arith.constant 0 : i32
    return %arg0, %c0_i32, %c0_i32_0 : i32, i32, i32
  }
  func.func @transform_1(%arg0: i32) -> (i32, i32, i32) {
    %c0_i32 = arith.constant 0 : i32
    %c0_i32_0 = arith.constant 0 : i32
    %c0_i32_1 = arith.constant 0 : i32
    return %arg0, %c0_i32, %c0_i32_0 : i32, i32, i32
  }
  func.func @transform_2(%arg0: i32) -> (i32, i32) {
    %c0_i32 = arith.constant 0 : i32
    %c0_i32_0 = arith.constant 0 : i32
    %c0_i32_1 = arith.constant 0 : i32
    return %c0_i32, %c0_i32_0 : i32, i32
  }
  func.func @transform_3(%arg0: i32) -> (i32, i32) {
    %c0_i32 = arith.constant 0 : i32
    %c0_i32_0 = arith.constant 0 : i32
    %c0_i32_1 = arith.constant 0 : i32
    return %c0_i32, %c0_i32_0 : i32, i32
  }
  func.func @transform_4(%arg0: i32) -> (i32, i32, i32) {
    %c0_i32 = arith.constant 0 : i32
    %c0_i32_0 = arith.constant 0 : i32
    %c0_i32_1 = arith.constant 0 : i32
    %c0_i32_2 = arith.constant 0 : i32
    return %c0_i32, %c0_i32_0, %c0_i32_1 : i32, i32, i32
  }
  func.func @transform_5(%arg0: i32) -> (i32, i32, i32) {
    %c0_i32 = arith.constant 0 : i32
    %c0_i32_0 = arith.constant 0 : i32
    %c0_i32_1 = arith.constant 0 : i32
    %c0_i32_2 = arith.constant 0 : i32
    return %c0_i32, %c0_i32_0, %c0_i32_1 : i32, i32, i32
  }
  func.func @transform_6(%arg0: i32) -> (i32, i32, i32) {
    %c0_i32 = arith.constant 0 : i32
    %c0_i32_0 = arith.constant 0 : i32
    %c0_i32_1 = arith.constant 0 : i32
    %c0_i32_2 = arith.constant 0 : i32
    return %c0_i32, %c0_i32_0, %c0_i32_1 : i32, i32, i32
  }
  func.func @transform_7(%arg0: i32) -> (i32, i32, i32) {
    %c0_i32 = arith.constant 0 : i32
    %c0_i32_0 = arith.constant 0 : i32
    %c0_i32_1 = arith.constant 0 : i32
    %c0_i32_2 = arith.constant 0 : i32
    return %c0_i32, %c0_i32_0, %c0_i32_1 : i32, i32, i32
  }
  func.func @transform_8(%arg0: i32) -> (i32, i32, i32) {
    %c0_i32 = arith.constant 0 : i32
    %c0_i32_0 = arith.constant 0 : i32
    %c0_i32_1 = arith.constant 0 : i32
    %c0_i32_2 = arith.constant 0 : i32
    return %c0_i32, %c0_i32_0, %c0_i32_1 : i32, i32, i32
  }
  func.func @transform_9(%arg0: i32) -> (i32, i32, i32) {
    %c0_i32 = arith.constant 0 : i32
    %c0_i32_0 = arith.constant 0 : i32
    %c0_i32_1 = arith.constant 0 : i32
    %c0_i32_2 = arith.constant 0 : i32
    return %c0_i32, %c0_i32_0, %c0_i32_1 : i32, i32, i32
  }
  func.func @transform_10(%arg0: i32) -> (i32, i32, i32) {
    %c0_i32 = arith.constant 0 : i32
    %c0_i32_0 = arith.constant 0 : i32
    %c0_i32_1 = arith.constant 0 : i32
    %c0_i32_2 = arith.constant 0 : i32
    return %c0_i32, %c0_i32_0, %c0_i32_1 : i32, i32, i32
  }
  func.func @transform_11(%arg0: i32) -> (i32, i32, i32) {
    %c0_i32 = arith.constant 0 : i32
    %c0_i32_0 = arith.constant 0 : i32
    %c0_i32_1 = arith.constant 0 : i32
    %c0_i32_2 = arith.constant 0 : i32
    return %c0_i32, %c0_i32_0, %c0_i32_1 : i32, i32, i32
  }
  func.func @transform_12(%arg0: i32) -> (i32, i32, i32) {
    %c0_i32 = arith.constant 0 : i32
    %c0_i32_0 = arith.constant 0 : i32
    %c0_i32_1 = arith.constant 0 : i32
    %c0_i32_2 = arith.constant 0 : i32
    return %c0_i32, %c0_i32_0, %c0_i32_1 : i32, i32, i32
  }
  func.func @transform_13(%arg0: i32) -> (i32, i32, i32) {
    %c0_i32 = arith.constant 0 : i32
    %c0_i32_0 = arith.constant 0 : i32
    %c0_i32_1 = arith.constant 0 : i32
    %c0_i32_2 = arith.constant 0 : i32
    return %c0_i32, %c0_i32_0, %c0_i32_1 : i32, i32, i32
  }
  func.func @transform_14(%arg0: i32) -> (i32, i32, i32) {
    %c0_i32 = arith.constant 0 : i32
    %c0_i32_0 = arith.constant 0 : i32
    %c0_i32_1 = arith.constant 0 : i32
    %c0_i32_2 = arith.constant 0 : i32
    return %c0_i32, %c0_i32_0, %c0_i32_1 : i32, i32, i32
  }
  func.func @transform_15(%arg0: i32) -> (i32, i32, i32) {
    %c0_i32 = arith.constant 0 : i32
    %c0_i32_0 = arith.constant 0 : i32
    %c0_i32_1 = arith.constant 0 : i32
    %c0_i32_2 = arith.constant 0 : i32
    return %c0_i32, %c0_i32_0, %c0_i32_1 : i32, i32, i32
  }
  func.func @transform_16(%arg0: i32) -> (i32, i32) {
    %c0_i32 = arith.constant 0 : i32
    %c0_i32_0 = arith.constant 0 : i32
    %c0_i32_1 = arith.constant 0 : i32
    return %c0_i32, %c0_i32_0 : i32, i32
  }
  func.func @transform_17(%arg0: i32) -> (i32, i32) {
    %c0_i32 = arith.constant 0 : i32
    %c0_i32_0 = arith.constant 0 : i32
    %c0_i32_1 = arith.constant 0 : i32
    return %c0_i32, %c0_i32_0 : i32, i32
  }
  func.func @transform_18(%arg0: i32) -> (i32, i32) {
    %c0_i32 = arith.constant 0 : i32
    %c0_i32_0 = arith.constant 0 : i32
    %c0_i32_1 = arith.constant 0 : i32
    return %c0_i32, %c0_i32_0 : i32, i32
  }
  func.func @transform_19(%arg0: i32) -> (i32, i32) {
    %c0_i32 = arith.constant 0 : i32
    %c0_i32_0 = arith.constant 0 : i32
    %c0_i32_1 = arith.constant 0 : i32
    return %c0_i32, %c0_i32_0 : i32, i32
  }
  func.func @transform_20(%arg0: i32) -> (i32, i32, i32) {
    %c0_i32 = arith.constant 0 : i32
    %c0_i32_0 = arith.constant 0 : i32
    %c0_i32_1 = arith.constant 0 : i32
    return %arg0, %c0_i32, %c0_i32_0 : i32, i32, i32
  }
}

</mosaic_0001>

<bundles_post_ra>
// kernel: tpu_custom_call.1
= control target key start
LH: loop header
LB: loop body
LE: loop exit
PB: predicated region body
PF: predicated region fallthrough
CT: control target
= control target key end

     0   :  { %s3159_s0 = inlined_call_operand.hbm [shape: f32[2,8,32], index: 0, kind: input, shape index: {}]   ;;  %s3160_s1 = inlined_call_operand.vmem [shape: f32[2,1,8], index: 1, kind: input, shape index: {}]   ;;  %s3161_s2 = inlined_call_operand.hbm [shape: f32[1,32], index: 2, kind: input, shape index: {}]   ;;  %s3162_s3 = inlined_call_operand.hbm [shape: f32[1,32], index: 3, kind: input, shape index: {}]   ;;  %s3163_s4 = inlined_call_operand.vmem [shape: f32[2,32,96], index: 4, kind: input, shape index: {}]   ;;  %s3164_s5 = inlined_call_operand.vmem [shape: f32[2,1,96], index: 5, kind: input, shape index: {}]   ;;  %s3165_s6 = inlined_call_operand.vmem [shape: f32[2,32,32], index: 6, kind: input, shape index: {}]   ;;  %s3166_s7 = inlined_call_operand.vmem [shape: f32[2,1,32], index: 7, kind: input, shape index: {}]   ;;  %s3167_s8 = inlined_call_operand.vmem [shape: f32[2,1,32], index: 8, kind: input, shape index: {}]   ;;  %s3168_s9 = inlined_call_operand.vmem [shape: f32[2,1,32], index: 9, kind: input, shape index: {}]   ;;  %s3169_s10 = inlined_call_operand.vmem [shape: f32[2,32,64], index: 10, kind: input, shape index: {}]   ;;  %s3170_s11 = inlined_call_operand.vmem [shape: f32[2,1,64], index: 11, kind: input, shape index: {}]   ;;  %s3171_s12 = inlined_call_operand.vmem [shape: f32[2,64,32], index: 12, kind: input, shape index: {}]   ;;  %s3172_s13 = inlined_call_operand.vmem [shape: f32[2,1,32], index: 13, kind: input, shape index: {}]   ;;  %s3173_s14 = inlined_call_operand.vmem [shape: f32[2,1,32], index: 14, kind: input, shape index: {}]   ;;  %s3174_s15 = inlined_call_operand.hbm [shape: f32[2,1,32], index: 15, kind: input, shape index: {}]   ;;  %s3175_s16 = inlined_call_operand.vmem [shape: f32[32,32], index: 16, kind: input, shape index: {}]   ;;  %s3176_s17 = inlined_call_operand.hbm [shape: f32[1,32], index: 17, kind: input, shape index: {}]   ;;  %s3177_s18 = inlined_call_operand.vmem [shape: f32[32,6], index: 18, kind: input, shape index: {}]   ;;  %s3178_s19 = inlined_call_operand.vmem [shape: f32[1,6], index: 19, kind: input, shape index: {}]   ;;  %s3179_s20 = inlined_call_operand.hbm [shape: f32[2,1,6], index: 20, kind: output, shape index: {}]  }
   0x1   :  { %3200 = sst [smem:[#allocation23_spill]] %s3159_s0 }
   0x2   :  { %3201 = sst [smem:[#allocation24_spill]] %s3160_s1 }
   0x3   :  { %3202 = sst [smem:[#allocation25_spill]] %s3161_s2 }
   0x4   :  { %3203 = sst [smem:[#allocation26_spill]] %s3162_s3 }
   0x5   :  { %3204 = sst [smem:[#allocation27_spill]] %s3163_s4 }
   0x6   :  { %3205 = sst [smem:[#allocation28_spill]] %s3174_s15 }
   0x7   :  { %3206 = sst [smem:[#allocation29_spill]] %s3175_s16 }
   0x8   :  { %3207 = sst [smem:[#allocation30_spill]] %s3176_s17 }
   0x9   :  { %3208 = sst [smem:[#allocation31_spill]] %s3177_s18 }
   0xa   :  { %3209 = sst [smem:[#allocation32_spill]] %s3178_s19 }
   0xb   :  { %3210 = sst [smem:[#allocation33_spill]] %s3179_s20 }
   0xc   :  { %25 = vsyncpa [#allocation5], 0 }
   0xd   :  { %27 = vsyncpa [#allocation5 + $0x1], 0 }
   0xe   :  { %28 = vsyncpa [#allocation8], 0 }
   0xf   :  { %29 = vsyncpa [#allocation11], 0 }
  0x10   :  { %30 = vsyncpa [#allocation6], 0 }
  0x11   :  { %32 = vsyncpa [#allocation6 + $0x1], 0  ;;  %s2633_s1 = smov 0   ;;  %s2635_s22 = smov 0  }
  0x12   :  { %s2637_s23 = smov 0   ;;  %s2639_s24 = smov 0  }
  0x13 LB: > { %3211 = sst [smem:[#allocation18_spill]] %s2493_s1  ;;  %s2657_s27 = sadd.s32 4294967295, %s2505_s24   ;;  %s2505_s24 = sphi %s2639_s24, %s3246_s24   ;;  %s2501_s23 = sphi %s2637_s23, %s3248_s23   ;;  %s2497_s22 = sphi %s2635_s22, %s3250_s22   ;;  %s2493_s1 = sphi %s2633_s1, %s3249_s1  }
  0x14   : > { %3212 = sst [smem:[#allocation19_spill]] %s2501_s23  ;;  %p2029_p0 = scmp.ge.s32.totalorder %s2505_s24, 1 }
  0x15   : > { %s3213_s3 = sld [smem:[#allocation25_spill]]  ;;  %p59_p1 = scmp.eq.s32.totalorder %s2657_s27, 0 }
  0x16   : > { %p499_p2 = scmp.lt.s32.totalorder %s2505_s24, 3  ;;  %s2507_s4 = smov [#allocation7]  }
  0x17   : > { %s513_s29 = sshll.u32 %s2507_s4, 4  ;;  %s3215_s15 = sld [smem:[#allocation28_spill]]  ;;  %s514_s29 = int_to_ptr.vmem [resolvable:$true] %s513_s29 }
  0x18   : > { %p2662_p3 = pnand %p2029_p0, %p499_p2  ;;  %s2508_s25 = smov [#allocation10]  }
  0x19   : > { %s2509_s4 = smov 16   ;;  %s2510_s30 = smov 1  }
  0x1a   : > { %p2128_p5 = pneg %p2662_p3  ;;  %s3217_s19 = sld [smem:[#allocation26_spill]] }
  0x1b   : > { %s511_s26 = sshll.u32 %s3213_s3, 4  ;;  %s569_s3 = sshll.u32 %s2508_s25, 4  ;;  %s512_s26 = int_to_ptr.hbm [resolvable:$true] %s511_s26  ;;  %s570_s3 = int_to_ptr.vmem [resolvable:$true] %s569_s3 }
  0x1c   : > { %p2674_p6 = pnand %p2128_p5, %p59_p1  ;;  %s2511_s25 = smov [#allocation9]  }
  0x1d   : > { %s567_s21 = sshll.u32 %s3215_s15, 4  ;;  %s525_s18 = sshll.u32 %s2511_s25, 4  ;;  %s568_s21 = int_to_ptr.hbm [resolvable:$true] %s567_s21  ;;  %s526_s18 = int_to_ptr.vmem [resolvable:$true] %s525_s18 }
  0x1e   : > { %2131 = dma.hbm_to_vmem [thread:$0]  (!%p2674_p6), %s512_s26, 16, %s514_s29, [#allocation8]  }
  0x1f   : > { %2137 = dma.hbm_to_vmem [thread:$0]  (!%p2674_p6), %s568_s21, 32, %s570_s3, [#allocation11], %s2509_s4, %s2509_s4, %s2510_s30  }
  0x20   : > { %s523_s20 = sshll.u32 %s3217_s19, 4  ;;  %s3218_s17 = sld [smem:[#allocation30_spill]]  ;;  %s524_s20 = int_to_ptr.hbm [resolvable:$true] %s523_s20 }
  0x21   : > { %2134 = dma.hbm_to_vmem [thread:$0]  (!%p2674_p6), %s524_s20, 16, %s526_s18, [#allocation8]  }
  0x22   : > { %s2512_s15 = smov [#allocation12]   ;;  %s2028_s21 = sadd.s32 4294967294, %s2505_s24  }
  0x23   : > { %s587_s19 = sshll.u32 %s2512_s15, 4  ;;  %s2694_s3 = sadd.s32 1, %s2505_s24   ;;  %s588_s19 = int_to_ptr.vmem [resolvable:$true] %s587_s19 }
  0x24   : > { %3219 = sst [smem:[#allocation20_spill]] %s2694_s3  ;;  %s42_s4 = ssub.s32 %s2505_s24, %s2694_s3 }
  0x25   : > { %s45_s30 = sadd.s32 1, %s2501_s23  ;;  %p43_p7 = scmp.eq.s32.totalorder %s42_s4, 0 }
  0x26   : > { %s585_s16 = sshll.u32 %s3218_s17, 4  ;;  %p52_p8 = scmp.ne.s32.totalorder %s2501_s23, %s2497_s22  ;;  %s586_s16 = int_to_ptr.hbm [resolvable:$true] %s585_s16 }
  0x27   : > { %2140 = dma.hbm_to_vmem [thread:$0]  (!%p2674_p6), %s586_s16, 16, %s588_s19, [#allocation11]  }
  0x28   : > { %p53_p9 = scmp.eq.s32.totalorder %s2505_s24, 0  ;;  %p58_p10 = scmp.ne.s32.totalorder %s2497_s22, %s2493_s1 }
  0x29   : > { %s2705_s18 = scalar_select %p43_p7, %s2501_s23, %s45_s30  }
  0x2a   : > { %p2707_p11 = por %p53_p9, %p52_p8  ;;  %p2713_p12 = por %p59_p1, %p58_p10 }
  0x2b   : > { %3220 = sst [smem:[#allocation21_spill]] %s2705_s18  ;;  %p486_p13 = scmp.eq.s32.totalorder %s2657_s27, 1 }
  0x2c   : > { %p492_p0 = scmp.eq.s32.totalorder %s2028_s21, 1  ;;  %p2153_p2 = scmp.lt.s32.totalorder %s2505_s24, 2 }
  0x2d   : > { %s604_s2 = sand.u32 1, %s2501_s23   ;;  %p2720_p5 = por %p486_p13, %p52_p8 }
  0x2e   : > { %p2724_p6 = por %p492_p0, %p58_p10  ;;  %s2035_s26 = sshll.u32 %s604_s2, 3 }
  0x2f   : > { %s2036_s29 = sshll.u32 %s2505_s24, 3  ;;  %s3226_s4 = sld [smem:[#allocation23_spill]] }
  0x30   : > { %s3224_s25 = scalar_select %p2724_p6, 1, 0 }
  0x31   : > { %s608_s17 = scalar_lea.vmem [#allocation4], %s2035_s26  ;;  %p2734_p7 = pnand %p2153_p2, %p2707_p11 }
  0x32   : > { %3225 = sst [smem:[#allocation22_spill]] %s3224_s25  ;;  %s616_s18 = sshll.u32 %s608_s17, 4  ;;  %s617_s18 = int_to_ptr.vmem [resolvable:$true] %s616_s18 }
  0x33   : > { %s605_s23 = scalar_lea.sflag [#allocation5], %s604_s2  ;;  %p2405_p9 = pneg %p2734_p7 }
  0x35   : > { %s612_s30 = scalar_lea.hbm %s3226_s4, %s2036_s29  ;;  %s2408_s29 = scalar_lea.hbm %s3226_s4, 16 }
  0x36   : > { %s614_s3 = sshll.u32 %s612_s30, 4  ;;  %s615_s3 = int_to_ptr.hbm [resolvable:$true] %s614_s3 }
  0x37   : > { %s2401_s1 = sshra.s32 %s615_s3, 4  ;;  %s2402_s1 = int_to_ptr.hbm [resolvable:$true] %s2401_s1 }
  0x38   : > { %s2403_s25 = scalar_lea.hbm %s2402_s1, 8  ;;  %p2409_p11 = scmp.lt.s32.totalorder %s2402_s1, %s3226_s4 }
  0x39   : > { %p2404_p8 = scmp.ne.s32.totalorder %s2402_s1, %s2403_s25  ;;  %p2410_p0 = scmp.lt.s32.totalorder %s2408_s29, %s2403_s25 }
  0x3b   : > { %p2406_p10 = pnand %p2405_p9, %p2404_p8  ;;  %p2411_p2 = por %p2410_p0, %p2409_p11 }
  0x3d   : > { %p2407_p13 = pneg %p2406_p10 }
  0x3f   : > { %p2412_p4 = pnand %p2411_p2, %p2407_p13 }
  0x41   : > { %2415 = shalt.err (!%p2412_p4)
}
  0x42   : > { %2144 = dma.hbm_to_vmem [thread:$0]  (!%p2734_p7), %s615_s3, 128, %s617_s18, %s605_s23  }
  0x43   : > { %631 = sbr.rel (%p2662_p3) target bundleno = 5199 (0x144f), region = 100  ;;  %s2751_s2 = sand.u32 (!%p2662_p3), 1, %s2497_s22  }
  0x44   : > { %s2038_s19 = sshll.u32 (!%p2662_p3), %s2751_s2, 3  ;;  %s634_s30 = scalar_lea.sflag (!%p2662_p3), [#allocation5], %s2751_s2 }
  0x45   : > { %s637_s26 = scalar_lea.vmem (!%p2662_p3), [#allocation4], %s2038_s19 }
  0x48   : > { %2476 = dma.done.wait (%p2713_p12), %s634_s30, 128  }
  0x49   : > { %2478 = vsyncadd (%p2713_p12), %s634_s30, 4294967168 }
  0x4a   : > { %2480 = dma.done.wait (%p59_p1), [#allocation8], 32  }
  0x4b   : > { %2482 = vsyncadd (%p59_p1), [#allocation8], 4294967264 }
  0x4c   : > { %2484 = dma.done.wait (%p59_p1), [#allocation11], 48  }
  0x4d   : > { %2486 = vsyncadd (%p59_p1), [#allocation11], 4294967248  ;;  %vm724_vm0 = vcmask 261120   ;;  %v721_v0 = vld [vmem:[%s637_s26] sm:$0xff]  ;;  %v2513_v2 = vmov 32.0   ;;  %s3228_s28 = sld [smem:[#allocation27_spill]] }
  0x4e   : > { %v725_v1 = vsel %vm724_vm0, %v721_v0, 0.0  ;;  %2231 = vrcp.f32 %v2513_v2  ;;  %v2212_v27 = vld [vmem:[#allocation7] ss:$0 sm:$0xff]  ;;  %v2213_v30 = vld [vmem:[#allocation9] ss:$0 sm:$0xff]  ;;  %vm793_vm5 = vcmask 785408  }
  0x4f   : > { %726 = vadd.xlane.f32.xlu0 %v725_v1  ;;  %v2214_v33 = vld [vmem:[%s3164_s5] ss:$0 sm:$0xff]  ;;  %s2514_s20 = smov 120   ;;  %s3196_s19 = smov 88   ;;  %vm799_vm6 = vcmask 64512   ;;  %vm940_vm7 = vcmask 130112  }
  0x50   : > { %s2516_s30 = smov 96   ;;  %s2517_s26 = smov 80   ;;  %vm1015_vm8 = vcmask 195712   ;;  %vm1090_vm9 = vcmask 261312  }
  0x51   : > { %s2518_s1 = smov 64   ;;  %s2519_s23 = smov 112  }
  0x52   : > { %s3195_s3 = smov 72   ;;  %p717_p1 = scmp.lt.s32.totalorder %s2657_s27, 1 }
  0x53   : > { %v765_v14 = vld [vmem:[%s3228_s28 + $0x18] sm:$0xff]  ;;  %v764_v15 = vld [vmem:[%s3228_s28 + $0x10] sm:$0xff]  ;;  %v763_v16 = vld [vmem:[%s3228_s28 + $0x8] sm:$0xff]  ;;  %s3229_s21 = sld [smem:[#allocation24_spill]]  ;;  %s3191_s29 = smov 48  }
  0x54   : > { %v2232_v3 = vpop.eup %2231  ;;  %785 = vmatpush.msra.mxu0 %v765_v14  ;;  %v762_v17 = vld [vmem:[%s3228_s28] sm:$0xff]  ;;  %s718_s18 = scalar_select %p717_p1, %s2657_s27, 1 }
  0x55   : > { %v729_v4 = vmul.f32 32.0, %v2232_v3  ;;  %vm733_vm1 = vweird.f32 %v2232_v3  ;;  %s3194_s15 = smov 104   ;;  %s3192_s16 = smov 40  }
  0x56   : > { %786 = vmatpush.msra.mxu0 %v764_v15  ;;  %s3193_s25 = smov 56  }
  0x57   : > { %v730_v5 = vsub.f32 1.0, %v729_v4 }
  0x58   : > { %787 = vmatpush.msra.mxu0 %v763_v16 }
  0x59   : > { %v731_v6 = vmul.f32 %v2232_v3, %v730_v5  ;;  %s719_s17 = scalar_lea.vmem %s3229_s21, %s718_s18  ;;  %s3190_s18 = smov 16  }
  0x5a   : > { %788 = vmatpush.msra.mxu0 %v762_v17  ;;  %v2822_v44 = vld [vmem:[%s719_s17] ss:$0 sm:$0xff]  ;;  %s3197_s21 = smov 8   ;;  %s2527_s17 = smov 24  }
  0x5b   : > { %v732_v7 = vadd.f32 %v2232_v3, %v731_v6 }
  0x5d   : > { %v2768_v8 = vsel %vm733_vm1, %v2232_v3, %v732_v7 }
  0xc2   : > { %v727_v9 = vpop.xlane.xlu0 %726 }
  0xc3   : > { %v735_v10 = vmul.f32 %v2768_v8, %v727_v9 }
  0xc5   : > { %v736_v11 = vsub.f32 %v721_v0, %v735_v10 }
  0xc7   : > { %v737_v12 = vmul.f32 %v736_v11, %v736_v11 }
  0xc9   : > { %v738_v13 = vsel %vm724_vm0, %v737_v12, 0.0 }
  0xca   : > { %739 = vadd.xlane.f32.xlu0 %v738_v13 }
 0x13d   : > { %v740_v18 = vpop.xlane.xlu0 %739 }
 0x13e   : > { %v741_v19 = vmul.f32 %v740_v18, %v2768_v8 }
 0x140   : > { %v742_v20 = vadd.f32 1e-05, %v741_v19 }
 0x142   : > { %2233 = vrsqrt.f32 %v742_v20  ;;  %vm749_vm3 = vweird.f32 %v742_v20 }
 0x148   : > { %v2234_v21 = vpop.eup %2233 }
 0x149   : > { %v744_v22 = vmul.f32 %v2234_v21, %v742_v20  ;;  %vm750_vm2 = vweird.f32 %v2234_v21 }
 0x14a   : > { %vm751_vm4 = vmor %vm749_vm3, %vm750_vm2  ;;  %vm1244_vm2 = vcmask 523264  }
 0x14b   : > { %v745_v23 = vmul.f32 %v2234_v21, %v744_v22 }
 0x14d   : > { %v746_v24 = vmul.f32 0.5, %v745_v23 }
 0x14f   : > { %v747_v25 = vsub.f32 1.5, %v746_v24 }
 0x151   : > { %v748_v26 = vmul.f32 %v2234_v21, %v747_v25 }
 0x153   : > { %v752_v28 = vsel %vm751_vm4, %v2234_v21, %v748_v26 }
 0x154   : > { %v753_v29 = vmul.f32 %v752_v28, %v736_v11 }
 0x156   : > { %v757_v31 = vmul.f32 %v2212_v27, %v753_v29 }
 0x158   : > { %v2785_v32 = vadd.f32 %v2213_v30, %v757_v31 }
 0x15a   : > { %2043 = vmatmul.msk.f32.vlgmr.msra.gmra.mxu0 %vm724_vm0, %v2785_v32 }
 0x1d7   : > { %v790_v34 = vpop.f32.mrf.mxu0 }
 0x1d8   : > { %v791_v35 = vadd.f32 %v2214_v33, %v790_v34 }
 0x1da   : > { %794 = vst.msk [vmem:[#allocation2] sm:$0xff] %vm793_vm5, %v791_v35 }
 0x1e1   : > { %v2793_v36 = vld [vmem:[#allocation2] sm:$0xff] }
 0x1e2   : > { %869 = vrot.lane.b32.xlu0 %v2793_v36, %s2514_s20  ;;  %871 = vrot.lane.b32.xlu2 %v2793_v36, %s3196_s19 }
 0x1e3   : > { %797 = vrot.lane.b32.xlu1 %v2793_v36, %s2516_s30 }
 0x1ea   : > { %946 = vrot.lane.b32.xlu0 %v2793_v36, %s2517_s26  ;;  %840 = vrot.lane.b32.xlu2 %v2793_v36, %s2518_s1 }
 0x1f2   : > { %944 = vrot.lane.b32.xlu0 %v2793_v36, %s2519_s23  ;;  %1021 = vrot.lane.b32.xlu2 %v2793_v36, %s3195_s3  ;;  %s3237_s3 = smov 16  }
 0x23c   : > { %v872_v37 = vpop.permute.xlu2 %871 }
 0x23d   : > { %2047 = vmatpush.xpose.msk.msra.mxu3 %vm799_vm6, %v872_v37 }
 0x244   : > { %v841_v38 = vpop.permute.xlu2 %840 }
 0x245   : > { %861 = vmatpush.msrb.mxu0 %v841_v38 }
 0x24c   : > { %v1022_v39 = vpop.permute.xlu2 %1021 }
 0x24d   : > { %2053 = vmatpush.xpose.msk.msra.mxu0 %vm799_vm6, %v1022_v39  ;;  %v1096_v39 = vld [vmem:[%s3165_s6 + $0x18] sm:$0xff] }
 0x254   : > { %v870_v40 = vpop.permute.xlu0 %869 }
 0x255   : > { %v798_v41 = vpop.permute.xlu1 %797  ;;  %2048 = vmatmul.msk.f32.vlgmr.msra.gmra.mxu3 %vm799_vm6, %v870_v40  ;;  %v1095_v40 = vld [vmem:[%s3165_s6 + $0x10] sm:$0xff] }
 0x256   : > { %2044 = vmatpush.xpose.msk.msra.mxu1 %vm799_vm6, %v798_v41  ;;  %v1094_v41 = vld [vmem:[%s3165_s6 + $0x8] sm:$0xff] }
 0x259   : > { %2045 = vmatmul.msk.f32.vlgmr.msra.gmra.mxu1 %vm799_vm6, %v2793_v36 }
 0x25c   : > { %v947_v42 = vpop.permute.xlu0 %946 }
 0x25d   : > { %2050 = vmatpush.xpose.msk.msrb.mxu1 %vm799_vm6, %v947_v42  ;;  %v1093_v42 = vld [vmem:[%s3165_s6] sm:$0xff] }
 0x261   : > { %1116 = vmatpush.msra.mxu1 %v1096_v39 }
 0x263   : > { %1117 = vmatpush.msra.mxu1 %v1095_v40 }
 0x264   : > { %v945_v43 = vpop.permute.xlu0 %944 }
 0x265   : > { %2051 = vmatmul.msk.f32.vlgmr.msrb.gmra.mxu1 %vm799_vm6, %v945_v43 }
 0x266   : > { %1118 = vmatpush.msra.mxu1 %v1094_v41 }
 0x268   : > { %1119 = vmatpush.msra.mxu1 %v1093_v42 }
 0x2d6   : > { %v821_v45 = vpop.f32.mrf.mxu1 }
 0x2d7   : > { %v824_v46 = vmul.f32 0.35355338, %v821_v45 }
 0x2d8   : > { %v894_v47 = vpop.f32.mrf.mxu3 }
 0x2d9   : > { %v828_v48 = vadd.f32 %v2822_v44, %v824_v46  ;;  %v897_v49 = vmul.f32 0.35355338, %v894_v47 }
 0x2db   : > { %v829_v50 = vsel %vm799_vm6, %v828_v48, -inf  ;;  %v898_v51 = vadd.f32 %v2822_v44, %v897_v49 }
 0x2dc   : > { %830 = vmax.xlane.f32.xlu1 %v829_v50 }
 0x2dd   : > { %v899_v54 = vsel %vm799_vm6, %v898_v51, -inf }
 0x2e2   : > { %v969_v52 = vpop.f32.mrf.mxu1 }
 0x2e3   : > { %v972_v53 = vmul.f32 0.35355338, %v969_v52 }
 0x2e4   : > { %900 = vmax.xlane.f32.xlu1 %v899_v54 }
 0x2e5   : > { %v973_v55 = vadd.f32 %v2822_v44, %v972_v53 }
 0x2e7   : > { %v974_v56 = vsel %vm799_vm6, %v973_v55, -inf }
 0x2e8   : > { %975 = vmax.xlane.f32.xlu0 %v974_v56 }
 0x2fc   : > { %985 = vrot.lane.b32.xlu0 %v2793_v36, %s3191_s29  ;;  %s3242_s29 = sld [smem:[#allocation32_spill]] }
 0x34f   : > { %v831_v57 = vpop.xlane.xlu1 %830 }
 0x350   : > { %v832_v58 = vsub.f32 %v828_v48, %v831_v57  ;;  %v2216_v48 = vld [vmem:[%s3166_s7] ss:$0 sm:$0xff] }
 0x352   : > { %v833_v59 = vmul.f32 1.442695, %v832_v58  ;;  %v1160_v58 = vld [vmem:[%s3169_s10 + $0x18] sm:$0xff] }
 0x354   : > { %2235 = vpow2.f32 %v833_v59  ;;  %v1158_v59 = vld [vmem:[%s3169_s10 + $0x8] sm:$0xff] }
 0x357   : > { %v901_v60 = vpop.xlane.xlu1 %900 }
 0x358   : > { %v902_v61 = vsub.f32 %v898_v51, %v901_v60  ;;  %v1157_v60 = vld [vmem:[%s3169_s10] sm:$0xff] }
 0x35a   : > { %v2236_v62 = vpop.eup %2235  ;;  %v903_v63 = vmul.f32 1.442695, %v902_v61 }
 0x35b   : > { %v976_v0 = vpop.xlane.xlu0 %975  ;;  %v835_v1 = vsel %vm799_vm6, %v2236_v62, 0.0 }
 0x35c   : > { %2237 = vpow2.f32 %v903_v63  ;;  %v977_v2 = vsub.f32 %v973_v55, %v976_v0  ;;  %836 = vadd.xlane.f32.xlu2 %v835_v1 }
 0x35e   : > { %v978_v3 = vmul.f32 1.442695, %v977_v2 }
 0x360   : > { %2239 = vpow2.f32 %v978_v3 }
 0x362   : > { %v2238_v4 = vpop.eup %2237 }
 0x363   : > { %v905_v5 = vsel %vm799_vm6, %v2238_v4, 0.0 }
 0x364   : > { %906 = vadd.xlane.f32.xlu1 %v905_v5 }
 0x366   : > { %v2240_v6 = vpop.eup %2239 }
 0x367   : > { %v980_v7 = vsel %vm799_vm6, %v2240_v6, 0.0 }
 0x36c   : > { %981 = vadd.xlane.f32.xlu1 %v980_v7 }
 0x36e   : > { %v986_v9 = vpop.permute.xlu0 %985 }
 0x36f   : > { %1006 = vmatpush.msrb.mxu3 %v986_v9 }
 0x371   : > { %1180 = vmatpush.msra.mxu3 %v1160_v58 }
 0x374   : > { %1019 = vrot.lane.b32.xlu2 %v2793_v36, %s3194_s15  ;;  %s3238_s15 = sld [smem:[#allocation29_spill]] }
 0x3cf   : > { %v837_v10 = vpop.xlane.xlu2 %836 }
 0x3d0   : > { %2241 = vrcp.f32 %v837_v10  ;;  %v2218_v10 = vld [vmem:[%s3168_s9] ss:$0 sm:$0xff] }
 0x3d6   : > { %v2242_v11 = vpop.eup %2241 }
 0x3d7   : > { %v907_v12 = vpop.xlane.xlu1 %906  ;;  %v839_v13 = vmul.f32 %v2242_v11, %v2236_v62  ;;  %v1020_v15 = vpop.permute.xlu2 %1019 }
 0x3d9   : > { %2046 = vmatmul.msk.f32.vlgmr.msrb.gmra.mxu0 %vm799_vm6, %v839_v13  ;;  %v2219_v13 = vld [vmem:[%s3170_s11] ss:$0 sm:$0xff] }
 0x3df   : > { %v982_v14 = vpop.xlane.xlu1 %981 }
 0x3e0   : > { %2243 = vrcp.f32 %v982_v14 }
 0x3e1   : > { %2054 = vmatmul.msk.f32.vlgmr.msra.gmra.mxu0 %vm799_vm6, %v1020_v15 }
 0x3e6   : > { %v2244_v16 = vpop.eup %2243 }
 0x3e7   : > { %v984_v17 = vmul.f32 %v2244_v16, %v2240_v6  ;;  %v2217_v6 = vld [vmem:[%s3167_s8] ss:$0 sm:$0xff] }
 0x3e9   : > { %2052 = vmatmul.msk.f32.vlgmr.msrb.gmra.mxu3 %vm799_vm6, %v984_v17 }
 0x456   : > { %v863_v18 = vpop.f32.mrf.mxu0 }
 0x457   : > { %866 = vst.msk [vmem:[#allocation3] sm:$0xff] %vm799_vm6, %v863_v18 }
 0x45e   : > { %v1044_v19 = vpop.f32.mrf.mxu0 }
 0x45f   : > { %v1047_v20 = vmul.f32 0.35355338, %v1044_v19  ;;  %v1239_v19 = vld [vmem:[%s3171_s12 + $0x38] sm:$0xff] }
 0x460   : > { %1256 = vmatpush.msrb.mxu0 %v1239_v19 }
 0x461   : > { %v1048_v21 = vadd.f32 %v2822_v44, %v1047_v20 }
 0x463   : > { %v1049_v22 = vsel %vm799_vm6, %v1048_v21, -inf }
 0x464   : > { %1050 = vmax.xlane.f32.xlu2 %v1049_v22  ;;  %v1238_v22 = vld [vmem:[%s3171_s12 + $0x30] sm:$0xff] }
 0x465   : > { %1257 = vmatpush.msrb.mxu0 %v1238_v22 }
 0x46c   : > { %v1008_v23 = vpop.f32.mrf.mxu3 }
 0x46d   : > { %1012 = vrot.lane.b32.xlu0 %v1008_v23, %s3190_s18  ;;  %s716_s18 = scalar_lea.vmem [#allocation13], %s2751_s2 }
 0x47c   : > { %1060 = vrot.lane.b32.xlu2 %v2793_v36, %s3192_s16  ;;  %s1913_s16 = sshll.u32 %s716_s18, 4  ;;  %s1914_s16 = int_to_ptr.vmem [resolvable:$true] %s1913_s16 }
 0x4d7   : > { %v1051_v24 = vpop.xlane.xlu2 %1050 }
 0x4d8   : > { %v1052_v25 = vsub.f32 %v1048_v21, %v1051_v24 }
 0x4da   : > { %v1053_v26 = vmul.f32 1.442695, %v1052_v25  ;;  %v1237_v25 = vld [vmem:[%s3171_s12 + $0x28] sm:$0xff] }
 0x4db   : > { %1258 = vmatpush.msrb.mxu0 %v1237_v25 }
 0x4dc   : > { %2245 = vpow2.f32 %v1053_v26 }
 0x4dd   : > { %2247 = vrcp.f32 %v907_v12 }
 0x4df   : > { %v1061_v34 = vpop.permute.xlu2 %1060  ;;  %v1013_v45 = vpop.permute.xlu0 %1012 }
 0x4e2   : > { %v2246_v27 = vpop.eup %2245 }
 0x4e3   : > { %v1055_v28 = vsel %vm799_vm6, %v2246_v27, 0.0  ;;  %v2248_v30 = vpop.eup %2247 }
 0x4e4   : > { %1056 = vadd.xlane.f32.xlu1 %v1055_v28  ;;  %v909_v33 = vmul.f32 %v2248_v30, %v2238_v4  ;;  %v1236_v28 = vld [vmem:[%s3171_s12 + $0x20] sm:$0xff]  ;;  %v1235_v30 = vld [vmem:[%s3171_s12 + $0x18] sm:$0xff] }
 0x4e5   : > { %1259 = vmatpush.msrb.mxu0 %v1236_v28 }
 0x4e7   : > { %1260 = vmatpush.msrb.mxu0 %v1235_v30  ;;  %v2223_v30 = vld [vmem:[%s3164_s5 + $0x1] ss:$0 sm:$0xff] }
 0x4fd   : > { %910 = vrot.lane.b32.xlu1 %v2793_v36, %s3193_s25  ;;  %s3235_s25 = smov 48  }
 0x557   : > { %v1057_v29 = vpop.xlane.xlu1 %1056 }
 0x558   : > { %2249 = vrcp.f32 %v1057_v29 }
 0x55e   : > { %v2250_v35 = vpop.eup %2249 }
 0x55f   : > { %v1059_v37 = vmul.f32 %v2250_v35, %v2246_v27 }
 0x56f   : > { %v911_v31 = vpop.permute.xlu1 %910 }
 0x570   : > { %931 = vmatpush.msra.mxu2 %v911_v31 }
 0x571   : > { %2049 = vmatmul.msk.f32.vlgmr.msra.gmra.mxu2 %vm799_vm6, %v909_v33 }
 0x572   : > { %1081 = vmatpush.msrb.mxu2 %v1061_v34  ;;  %v1234_v34 = vld [vmem:[%s3171_s12 + $0x10] sm:$0xff] }
 0x573   : > { %1261 = vmatpush.msrb.mxu0 %v1234_v34 }
 0x579   : > { %2055 = vmatmul.msk.f32.vlgmr.msrb.gmra.mxu2 %vm799_vm6, %v1059_v37  ;;  %v1233_v37 = vld [vmem:[%s3171_s12 + $0x8] sm:$0xff] }
 0x57a   : > { %1262 = vmatpush.msrb.mxu0 %v1233_v37 }
 0x5f4   : > { %v933_v38 = vpop.f32.mrf.mxu2 }
 0x5f5   : > { %937 = vrot.lane.b32.xlu1 %v933_v38, %s3197_s21  ;;  %s3236_s21 = smov 8  }
 0x5fc   : > { %v1083_v36 = vpop.f32.mrf.mxu2 }
 0x5fd   : > { %1087 = vrot.lane.b32.xlu1 %v1083_v36, %s2527_s17  ;;  %v1232_v36 = vld [vmem:[%s3171_s12] sm:$0xff] }
 0x5fe   : > { %1263 = vmatpush.msrb.mxu0 %v1232_v36 }
 0x667   : > { %v938_v43 = vpop.permute.xlu1 %937 }
 0x668   : > { %941 = vst.msk [vmem:[#allocation3] sm:$0xff] %vm940_vm7, %v938_v43 }
 0x669   : > { %1016 = vst.msk [vmem:[#allocation3] sm:$0xff] %vm1015_vm8, %v1013_v45 }
 0x66f   : > { %v1088_v46 = vpop.permute.xlu1 %1087 }
 0x670   : > { %1091 = vst.msk [vmem:[#allocation3] sm:$0xff] %vm1090_vm9, %v1088_v46 }
 0x677   : > { %v1092_v47 = vld [vmem:[#allocation3] sm:$0xff] }
 0x678   : > { %2056 = vmatmul.msk.f32.vlgmr.msra.gmra.mxu1 %vm724_vm0, %v1092_v47 }
 0x6f5   : > { %v1121_v49 = vpop.f32.mrf.mxu1 }
 0x6f6   : > { %v1122_v50 = vadd.f32 %v2216_v48, %v1121_v49 }
 0x6f8   : > { %v1124_v51 = vadd.f32 %v1122_v50, %v2785_v32  ;;  %v1159_v32 = vld [vmem:[%s3169_s10 + $0x10] sm:$0xff] }
 0x6f9   : > { %1181 = vmatpush.msra.mxu3 %v1159_v32 }
 0x6fa   : > { %v1127_v52 = vsel %vm724_vm0, %v1124_v51, 0.0 }
 0x6fb   : > { %1128 = vadd.xlane.f32.xlu2 %v1127_v52  ;;  %1182 = vmatpush.msra.mxu3 %v1158_v59 }
 0x6fd   : > { %1183 = vmatpush.msra.mxu3 %v1157_v60 }
 0x76e   : > { %v1129_v53 = vpop.xlane.xlu2 %1128 }
 0x76f   : > { %v1130_v54 = vmul.f32 %v1129_v53, %v2768_v8 }
 0x771   : > { %v1131_v55 = vsub.f32 %v1124_v51, %v1130_v54 }
 0x773   : > { %v1132_v56 = vmul.f32 %v1131_v55, %v1131_v55 }
 0x775   : > { %v1133_v57 = vsel %vm724_vm0, %v1132_v56, 0.0 }
 0x776   : > { %1134 = vadd.xlane.f32.xlu0 %v1133_v57 }
 0x7e9   : > { %v1135_v61 = vpop.xlane.xlu0 %1134 }
 0x7ea   : > { %v1136_v62 = vmul.f32 %v1135_v61, %v2768_v8 }
 0x7ec   : > { %v1137_v63 = vadd.f32 1e-05, %v1136_v62 }
 0x7ee   : > { %2251 = vrsqrt.f32 %v1137_v63  ;;  %vm1144_vm11 = vweird.f32 %v1137_v63 }
 0x7f4   : > { %v2252_v0 = vpop.eup %2251 }
 0x7f5   : > { %v1139_v1 = vmul.f32 %v2252_v0, %v1137_v63  ;;  %vm1145_vm10 = vweird.f32 %v2252_v0 }
 0x7f6   : > { %vm1146_vm12 = vmor %vm1144_vm11, %vm1145_vm10 }
 0x7f7   : > { %v1140_v2 = vmul.f32 %v2252_v0, %v1139_v1 }
 0x7f9   : > { %v1141_v3 = vmul.f32 0.5, %v1140_v2 }
 0x7fb   : > { %v1142_v4 = vsub.f32 1.5, %v1141_v3 }
 0x7fd   : > { %v1143_v5 = vmul.f32 %v2252_v0, %v1142_v4 }
 0x7ff   : > { %v1147_v7 = vsel %vm1146_vm12, %v2252_v0, %v1143_v5  ;;  %v2220_v0 = vld [vmem:[%s3172_s13] ss:$0 sm:$0xff] }
 0x800   : > { %v1148_v9 = vmul.f32 %v1147_v7, %v1131_v55 }
 0x802   : > { %v1152_v11 = vmul.f32 %v2217_v6, %v1148_v9 }
 0x804   : > { %v2895_v12 = vadd.f32 %v2218_v10, %v1152_v11  ;;  %v2063_v11 = vld [vmem:[%s3228_s28 + $0x38] sm:$0xff] }
 0x805   : > { %1326 = vmatpush.msra.mxu2 %v2063_v11 }
 0x806   : > { %2057 = vmatmul.msk.f32.vlgmr.msra.gmra.mxu3 %vm724_vm0, %v2895_v12 }
 0x889   : > { %v1185_v14 = vpop.f32.mrf.mxu3 }
 0x88a   : > { %v1186_v15 = vadd.f32 %v2219_v13, %v1185_v14  ;;  %v2061_v13 = vld [vmem:[%s3228_s28 + $0x28] sm:$0xff]  ;;  %v2060_v14 = vld [vmem:[%s3228_s28 + $0x20] sm:$0xff] }
 0x88c   : > { %v1189_v16 = vmul.f32 0.70710677, %v1186_v15  ;;  %v1188_v61 = vmul.f32 0.5, %v1186_v15 }
 0x88e   : > { %v1190_v17 = vmul.f32 %v1189_v16, %v1189_v16 }
 0x890   : > { %v1191_v18 = vmin.f32 %v1190_v17, 16.0 }
 0x892   : > { %v1192_v20 = vmul.f32 2.1237322e-06, %v1191_v18  ;;  %v1203_v21 = vmul.f32 3.8918573e-05, %v1191_v18 }
 0x894   : > { %v1193_v23 = vadd.f32 0.00028619796, %v1192_v20  ;;  %v1204_v24 = vadd.f32 0.001143296, %v1203_v21 }
 0x896   : > { %v1194_v26 = vmul.f32 %v1193_v23, %v1191_v18  ;;  %v1205_v27 = vmul.f32 %v1204_v24, %v1191_v18  ;;  %v2221_v24 = vld [vmem:[%s3173_s14] ss:$0 sm:$0xff] }
 0x898   : > { %v1206_v29 = vadd.f32 0.014752088, %v1205_v27  ;;  %v1195_v31 = vadd.f32 0.0036580483, %v1194_v26  ;;  %v2222_v27 = vld [vmem:[#allocation10] ss:$0 sm:$0xff] }
 0x89a   : > { %v1207_v33 = vmul.f32 %v1206_v29, %v1191_v18  ;;  %v1196_v38 = vmul.f32 %v1195_v31, %v1191_v18 }
 0x89c   : > { %v1208_v35 = vadd.f32 0.112945676, %v1207_v33  ;;  %v1197_v41 = vadd.f32 0.05243302, %v1196_v38 }
 0x89e   : > { %v1209_v39 = vmul.f32 %v1208_v35, %v1191_v18  ;;  %v1198_v45 = vmul.f32 %v1197_v41, %v1191_v18 }
 0x8a0   : > { %v1210_v40 = vadd.f32 0.4994258, %v1209_v39  ;;  %v1199_v46 = vadd.f32 0.18741608, %v1198_v45 }
 0x8a2   : > { %v1211_v42 = vmul.f32 %v1210_v40, %v1191_v18  ;;  %v1200_v48 = vmul.f32 %v1199_v46, %v1191_v18 }
 0x8a4   : > { %v1212_v43 = vadd.f32 1.0, %v1211_v42  ;;  %v1201_v52 = vadd.f32 1.1283791, %v1200_v48 }
 0x8a6   : > { %2253 = vrcp.f32 %v1212_v43  ;;  %v1224_v51 = vand.u32 2147483648, %v1212_v43  ;;  %v1222_v54 = vand.u32 2147483647, %v1212_v43  ;;  %vm1218_vm14 = vweird.f32 %v1212_v43 }
 0x8a7   : > { %v1202_v57 = vmul.f32 %v1201_v52, %v1189_v16 }
 0x8a8   : > { %v1225_v56 = vor.u32 1.1754944e-38, %v1224_v51  ;;  %vm1223_vm1 = vcmp.eq.f32.partialorder %v1222_v54, 8.507059e+37 }
 0x8ac   : > { %v2254_v47 = vpop.eup %2253 }
 0x8ad   : > { %v1214_v49 = vmul.f32 %v2254_v47, %v1212_v43  ;;  %vm1219_vm13 = vweird.f32 %v2254_v47 }
 0x8ae   : > { %vm1220_vm15 = vmor %vm1218_vm14, %vm1219_vm13 }
 0x8af   : > { %v1215_v50 = vsub.f32 1.0, %v1214_v49 }
 0x8b1   : > { %v1216_v53 = vmul.f32 %v2254_v47, %v1215_v50 }
 0x8b3   : > { %v1217_v55 = vadd.f32 %v2254_v47, %v1216_v53 }
 0x8b5   : > { %v1221_v58 = vsel %vm1220_vm15, %v2254_v47, %v1217_v55 }
 0x8b6   : > { %v1226_v32 = vsel %vm1223_vm1, %v1225_v56, %v1221_v58  ;;  %vm1900_vm1 = vcmask 40960  }
 0x8b7   : > { %v1227_v59 = vmul.f32 %v1226_v32, %v1202_v57 }
 0x8b9   : > { %v2058_v60 = vclamps-f32 %v1227_v59, 1.0 }
 0x8bb   : > { %v1230_v62 = vadd.f32 1.0, %v2058_v60 }
 0x8bd   : > { %v1231_v63 = vmul.f32 %v1230_v62, %v1188_v61 }
 0x8bf   : > { %2059 = vmatmul.msk.f32.vlgmr.msrb.gmra.mxu0 %vm1244_vm2, %v1231_v63 }
 0x93c   : > { %v1265_v1 = vpop.f32.mrf.mxu0 }
 0x93d   : > { %v1266_v2 = vadd.f32 %v2220_v0, %v1265_v1 }
 0x93f   : > { %v1268_v3 = vadd.f32 %v1266_v2, %v2895_v12  ;;  %v2062_v12 = vld [vmem:[%s3228_s28 + $0x30] sm:$0xff] }
 0x940   : > { %1327 = vmatpush.msra.mxu2 %v2062_v12 }
 0x941   : > { %v1271_v4 = vsel %vm724_vm0, %v1268_v3, 0.0 }
 0x942   : > { %1272 = vadd.xlane.f32.xlu1 %v1271_v4  ;;  %1328 = vmatpush.msra.mxu2 %v2061_v13 }
 0x944   : > { %1329 = vmatpush.msra.mxu2 %v2060_v14 }
 0x9b5   : > { %v1273_v5 = vpop.xlane.xlu1 %1272 }
 0x9b6   : > { %v1274_v6 = vmul.f32 %v1273_v5, %v2768_v8 }
 0x9b8   : > { %v1275_v7 = vsub.f32 %v1268_v3, %v1274_v6 }
 0x9ba   : > { %v1276_v9 = vmul.f32 %v1275_v7, %v1275_v7 }
 0x9bc   : > { %v1277_v10 = vsel %vm724_vm0, %v1276_v9, 0.0 }
 0x9bd   : > { %1278 = vadd.xlane.f32.xlu2 %v1277_v10 }
 0xa30   : > { %v1279_v15 = vpop.xlane.xlu2 %1278 }
 0xa31   : > { %v1280_v16 = vmul.f32 %v1279_v15, %v2768_v8 }
 0xa33   : > { %v1281_v17 = vadd.f32 1e-05, %v1280_v16 }
 0xa35   : > { %2255 = vrsqrt.f32 %v1281_v17  ;;  %vm1288_vm4 = vweird.f32 %v1281_v17 }
 0xa3b   : > { %v2256_v18 = vpop.eup %2255 }
 0xa3c   : > { %v1283_v19 = vmul.f32 %v2256_v18, %v1281_v17  ;;  %vm1289_vm3 = vweird.f32 %v2256_v18 }
 0xa3d   : > { %vm1290_vm10 = vmor %vm1288_vm4, %vm1289_vm3 }
 0xa3e   : > { %v1284_v20 = vmul.f32 %v2256_v18, %v1283_v19 }
 0xa40   : > { %v1285_v21 = vmul.f32 0.5, %v1284_v20 }
 0xa42   : > { %v1286_v22 = vsub.f32 1.5, %v1285_v21 }
 0xa44   : > { %v1287_v23 = vmul.f32 %v2256_v18, %v1286_v22 }
 0xa46   : > { %v1291_v25 = vsel %vm1290_vm10, %v2256_v18, %v1287_v23 }
 0xa47   : > { %v1292_v26 = vmul.f32 %v1291_v25, %v1275_v7 }
 0xa49   : > { %v1296_v28 = vmul.f32 %v2221_v24, %v1292_v26 }
 0xa4b   : > { %v2950_v29 = vadd.f32 %v2222_v27, %v1296_v28 }
 0xa4d   : > { %2065 = vmatmul.msk.f32.vlgmr.msra.gmra.mxu2 %vm724_vm0, %v2950_v29 }
 0xad0   : > { %v1331_v31 = vpop.f32.mrf.mxu2 }
 0xad1   : > { %v1332_v33 = vadd.f32 %v2223_v30, %v1331_v31 }
 0xad3   : > { %1334 = vst.msk [vmem:[#allocation2] sm:$0xff] %vm793_vm5, %v1332_v33 }
 0xada   : > { %v2958_v34 = vld [vmem:[#allocation2] sm:$0xff] }
 0xadb   : > { %1376 = vrot.lane.b32.xlu2 %v2958_v34, %s2518_s1  ;;  %1337 = vrot.lane.b32.xlu0 %v2958_v34, %s2516_s30  ;;  %s3231_s30 = smov 72   ;;  %s3233_s1 = smov 56  }
 0xae3   : > { %1405 = vrot.lane.b32.xlu0 %v2958_v34, %s2514_s20  ;;  %s3230_s20 = smov 88  }
 0xaeb   : > { %1481 = vrot.lane.b32.xlu0 %v2958_v34, %s2517_s26  ;;  %s3232_s26 = smov 104  }
 0xaf3   : > { %1479 = vrot.lane.b32.xlu0 %v2958_v34, %s2519_s23  ;;  %s3234_s23 = smov 40  }
 0xb35   : > { %v1377_v35 = vpop.permute.xlu2 %1376 }
 0xb36   : > { %1397 = vmatpush.msrb.mxu3 %v1377_v35 }
 0xb4d   : > { %v1338_v37 = vpop.permute.xlu0 %1337 }
 0xb4e   : > { %2066 = vmatpush.xpose.msk.msrb.mxu1 %vm799_vm6, %v1338_v37 }
 0xb51   : > { %2067 = vmatmul.msk.f32.vlgmr.msrb.gmra.mxu1 %vm799_vm6, %v2958_v34 }
 0xb55   : > { %v1406_v38 = vpop.permute.xlu0 %1405 }
 0xb5d   : > { %v1482_v36 = vpop.permute.xlu0 %1481 }
 0xb5e   : > { %2072 = vmatpush.xpose.msk.msra.mxu3 %vm799_vm6, %v1482_v36  ;;  %v2080_v36 = vld [vmem:[%s3165_s6 + $0x30] sm:$0xff] }
 0xb65   : > { %v1480_v55 = vpop.permute.xlu0 %1479 }
 0xbce   : > { %v1360_v39 = vpop.f32.mrf.mxu1 }
 0xbcf   : > { %v1363_v40 = vmul.f32 0.35355338, %v1360_v39  ;;  %v2079_v39 = vld [vmem:[%s3165_s6 + $0x28] sm:$0xff] }
 0xbd1   : > { %v1364_v41 = vadd.f32 %v2822_v44, %v1363_v40  ;;  %v2078_v40 = vld [vmem:[%s3165_s6 + $0x20] sm:$0xff] }
 0xbd3   : > { %v1365_v42 = vsel %vm799_vm6, %v1364_v41, -inf }
 0xbd4   : > { %1366 = vmax.xlane.f32.xlu1 %v1365_v42 }
 0xbed   : > { %1407 = vrot.lane.b32.xlu1 %v2958_v34, %s3230_s20 }
 0xbf5   : > { %1555 = vrot.lane.b32.xlu1 %v2958_v34, %s3231_s30 }
 0xc47   : > { %v1367_v43 = vpop.xlane.xlu1 %1366 }
 0xc48   : > { %v1368_v45 = vsub.f32 %v1364_v41, %v1367_v43 }
 0xc4a   : > { %v1369_v46 = vmul.f32 1.442695, %v1368_v45  ;;  %v2224_v45 = vld [vmem:[%s3166_s7 + $0x1] ss:$0 sm:$0xff] }
 0xc4c   : > { %2257 = vpow2.f32 %v1369_v46 }
 0xc52   : > { %v2258_v47 = vpop.eup %2257 }
 0xc53   : > { %v1371_v48 = vsel %vm799_vm6, %v2258_v47, 0.0 }
 0xc54   : > { %1372 = vadd.xlane.f32.xlu2 %v1371_v48 }
 0xc5f   : > { %v1408_v49 = vpop.permute.xlu1 %1407 }
 0xc60   : > { %2069 = vmatpush.xpose.msk.msrb.mxu2 %vm799_vm6, %v1408_v49 }
 0xc63   : > { %2070 = vmatmul.msk.f32.vlgmr.msrb.gmra.mxu2 %vm799_vm6, %v1406_v38  ;;  %v2081_v38 = vld [vmem:[%s3165_s6 + $0x38] sm:$0xff] }
 0xc67   : > { %v1556_v50 = vpop.permute.xlu1 %1555 }
 0xc68   : > { %2075 = vmatpush.xpose.msk.msra.mxu2 %vm799_vm6, %v1556_v50 }
 0xc6c   : > { %1553 = vrot.lane.b32.xlu2 %v2958_v34, %s3232_s26 }
 0xcc7   : > { %v1373_v51 = vpop.xlane.xlu2 %1372 }
 0xcc8   : > { %2259 = vrcp.f32 %v1373_v51 }
 0xcce   : > { %v2260_v52 = vpop.eup %2259 }
 0xccf   : > { %v1375_v53 = vmul.f32 %v2260_v52, %v2258_v47  ;;  %v1554_v54 = vpop.permute.xlu2 %1553 }
 0xcd0   : > { %2076 = vmatmul.msk.f32.vlgmr.msra.gmra.mxu2 %vm799_vm6, %v1554_v54 }
 0xcd1   : > { %2068 = vmatmul.msk.f32.vlgmr.msrb.gmra.mxu3 %vm799_vm6, %v1375_v53 }
 0xcd2   : > { %1651 = vmatpush.msrb.mxu3 %v2081_v38 }
 0xcd4   : > { %1652 = vmatpush.msrb.mxu3 %v2080_v36 }
 0xcd6   : > { %1653 = vmatpush.msrb.mxu3 %v2079_v39 }
 0xcd8   : > { %1654 = vmatpush.msrb.mxu3 %v2078_v40 }
 0xcd9   : > { %2073 = vmatmul.msk.f32.vlgmr.msra.gmra.mxu3 %vm799_vm6, %v1480_v55  ;;  %v2089_v55 = vld [vmem:[%s3169_s10 + $0x38] sm:$0xff] }
 0xce6   : > { %v1430_v56 = vpop.f32.mrf.mxu2 }
 0xce7   : > { %v1433_v57 = vmul.f32 0.35355338, %v1430_v56  ;;  %v2087_v56 = vld [vmem:[%s3169_s10 + $0x28] sm:$0xff] }
 0xce9   : > { %v1434_v58 = vadd.f32 %v2822_v44, %v1433_v57  ;;  %v2086_v57 = vld [vmem:[%s3169_s10 + $0x20] sm:$0xff] }
 0xceb   : > { %v1435_v32 = vsel %vm799_vm6, %v1434_v58, -inf }
 0xcec   : > { %1436 = vmax.xlane.f32.xlu1 %v1435_v32 }
 0xd53   : > { %v1578_v59 = vpop.f32.mrf.mxu2 }
 0xd54   : > { %v1581_v60 = vmul.f32 0.35355338, %v1578_v59  ;;  %v1399_v61 = vpop.f32.mrf.mxu3 }
 0xd55   : > { %1402 = vst.msk [vmem:[#allocation3] sm:$0xff] %vm799_vm6, %v1399_v61 }
 0xd56   : > { %v1582_v62 = vadd.f32 %v2822_v44, %v1581_v60 }
 0xd58   : > { %v1583_v63 = vsel %vm799_vm6, %v1582_v62, -inf }
 0xd59   : > { %1584 = vmax.xlane.f32.xlu2 %v1583_v63 }
 0xd5c   : > { %v1504_v0 = vpop.f32.mrf.mxu3 }
 0xd5d   : > { %v1507_v1 = vmul.f32 0.35355338, %v1504_v0 }
 0xd5f   : > { %v1437_v2 = vpop.xlane.xlu1 %1436  ;;  %v1508_v3 = vadd.f32 %v2822_v44, %v1507_v1 }
 0xd60   : > { %v1438_v4 = vsub.f32 %v1434_v58, %v1437_v2  ;;  %v2225_v2 = vld [vmem:[%s3167_s8 + $0x1] ss:$0 sm:$0xff] }
 0xd61   : > { %v1509_v5 = vsel %vm799_vm6, %v1508_v3, -inf }
 0xd62   : > { %v1439_v6 = vmul.f32 1.442695, %v1438_v4  ;;  %1510 = vmax.xlane.f32.xlu0 %v1509_v5  ;;  %v2226_v5 = vld [vmem:[%s3168_s9 + $0x1] ss:$0 sm:$0xff] }
 0xd64   : > { %2261 = vpow2.f32 %v1439_v6 }
 0xd6a   : > { %v2262_v7 = vpop.eup %2261 }
 0xd6b   : > { %v1441_v9 = vsel %vm799_vm6, %v2262_v7, 0.0 }
 0xd6c   : > { %1442 = vadd.xlane.f32.xlu1 %v1441_v9  ;;  %v2227_v9 = vld [vmem:[%s3170_s11 + $0x1] ss:$0 sm:$0xff] }
 0xd85   : > { %1446 = vrot.lane.b32.xlu1 %v2958_v34, %s3233_s1  ;;  %s3240_s1 = sld [smem:[#allocation33_spill]] }
 0xdcc   : > { %v1585_v10 = vpop.xlane.xlu2 %1584 }
 0xdcd   : > { %v1586_v11 = vsub.f32 %v1582_v62, %v1585_v10 }
 0xdcf   : > { %v1587_v12 = vmul.f32 1.442695, %v1586_v11 }
 0xdd1   : > { %2263 = vpow2.f32 %v1587_v12 }
 0xdd5   : > { %v1511_v13 = vpop.xlane.xlu0 %1510 }
 0xdd6   : > { %v1512_v14 = vsub.f32 %v1508_v3, %v1511_v13 }
 0xdd7   : > { %v2264_v44 = vpop.eup %2263 }
 0xdd8   : > { %v1513_v15 = vmul.f32 1.442695, %v1512_v14  ;;  %v1589_v16 = vsel %vm799_vm6, %v2264_v44, 0.0 }
 0xdd9   : > { %1590 = vadd.xlane.f32.xlu2 %v1589_v16 }
 0xdda   : > { %2265 = vpow2.f32 %v1513_v15 }
 0xddf   : > { %v1443_v19 = vpop.xlane.xlu1 %1442 }
 0xde0   : > { %v2266_v17 = vpop.eup %2265  ;;  %2267 = vrcp.f32 %v1443_v19 }
 0xde1   : > { %v1515_v18 = vsel %vm799_vm6, %v2266_v17, 0.0 }
 0xde2   : > { %1516 = vadd.xlane.f32.xlu0 %v1515_v18 }
 0xde6   : > { %v2268_v20 = vpop.eup %2267 }
 0xde7   : > { %v1445_v21 = vmul.f32 %v2268_v20, %v2262_v7  ;;  %v2098_v20 = vld [vmem:[%s3171_s12 + $0x68] sm:$0xff] }
 0xdf1   : > { %1594 = vrot.lane.b32.xlu2 %v2958_v34, %s3234_s23  ;;  %s1911_s23 = scalar_lea.hbm %s3240_s1, %s2657_s27 }
 0xdf2   : > { %s1915_s20 = sshll.u32 %s1911_s23, 4  ;;  %s1916_s20 = int_to_ptr.hbm [resolvable:$true] %s1915_s20 }
 0xdf6   : > { %1520 = vrot.lane.b32.xlu0 %v2958_v34, %s3235_s25  ;;  %s3241_s25 = smov %s3240_s1 }
 0xdf7   : > { %v1447_v22 = vpop.permute.xlu1 %1446  ;;  %s2451_s26 = scalar_lea.hbm %s3241_s25, 2 }
 0xdf8   : > { %1467 = vmatpush.msra.mxu1 %v1447_v22 }
 0xdf9   : > { %2071 = vmatmul.msk.f32.vlgmr.msra.gmra.mxu1 %vm799_vm6, %v1445_v21 }
 0xe4c   : > { %v1591_v23 = vpop.xlane.xlu2 %1590 }
 0xe4d   : > { %2269 = vrcp.f32 %v1591_v23  ;;  %v2097_v23 = vld [vmem:[%s3171_s12 + $0x60] sm:$0xff] }
 0xe53   : > { %v2270_v24 = vpop.eup %2269 }
 0xe54   : > { %v1593_v25 = vmul.f32 %v2270_v24, %v2264_v44  ;;  %v1595_v26 = vpop.permute.xlu2 %1594  ;;  %v2100_v44 = vld [vmem:[%s3171_s12 + $0x78] sm:$0xff] }
 0xe55   : > { %1615 = vmatpush.msrb.mxu1 %v1595_v26  ;;  %v1517_v27 = vpop.xlane.xlu0 %1516  ;;  %1796 = vmatpush.msrb.mxu2 %v2100_v44 }
 0xe56   : > { %2077 = vmatmul.msk.f32.vlgmr.msrb.gmra.mxu1 %vm799_vm6, %v1593_v25  ;;  %2271 = vrcp.f32 %v1517_v27  ;;  %v2096_v25 = vld [vmem:[%s3171_s12 + $0x58] sm:$0xff] }
 0xe5c   : > { %v2272_v28 = vpop.eup %2271 }
 0xe5d   : > { %v1519_v30 = vmul.f32 %v2272_v28, %v2266_v17  ;;  %v2099_v17 = vld [vmem:[%s3171_s12 + $0x70] sm:$0xff] }
 0xe5e   : > { %1797 = vmatpush.msrb.mxu2 %v2099_v17  ;;  %v2095_v28 = vld [vmem:[%s3171_s12 + $0x50] sm:$0xff] }
 0xe60   : > { %1798 = vmatpush.msrb.mxu2 %v2098_v20 }
 0xe62   : > { %1799 = vmatpush.msrb.mxu2 %v2097_v23 }
 0xe64   : > { %1800 = vmatpush.msrb.mxu2 %v2096_v25 }
 0xe66   : > { %1801 = vmatpush.msrb.mxu2 %v2095_v28 }
 0xe68   : > { %v1521_v31 = vpop.permute.xlu0 %1520 }
 0xe69   : > { %1541 = vmatpush.msra.mxu0 %v1521_v31  ;;  %v2094_v31 = vld [vmem:[%s3171_s12 + $0x48] sm:$0xff] }
 0xe6a   : > { %2074 = vmatmul.msk.f32.vlgmr.msra.gmra.mxu0 %vm799_vm6, %v1519_v30  ;;  %1802 = vmatpush.msrb.mxu2 %v2094_v31 }
 0xe6b   : > { %1719 = vmatpush.msrb.mxu0 %v2089_v55 }
 0xe76   : > { %v1469_v33 = vpop.f32.mrf.mxu1 }
 0xe77   : > { %1473 = vrot.lane.b32.xlu0 %v1469_v33, %s3236_s21 }
 0xed3   : > { %v1617_v34 = vpop.f32.mrf.mxu1 }
 0xed4   : > { %1621 = vrot.lane.b32.xlu2 %v1617_v34, %s2527_s17  ;;  %v2093_v34 = vld [vmem:[%s3171_s12 + $0x40] sm:$0xff]  ;;  %s1903_s17 = scalar_lea.sflag [#allocation6], %s2751_s2 }
 0xed5   : > { %1803 = vmatpush.msrb.mxu2 %v2093_v34 }
 0xee7   : > { %v1543_v35 = vpop.f32.mrf.mxu0 }
 0xee8   : > { %1547 = vrot.lane.b32.xlu1 %v1543_v35, %s3237_s3  ;;  %s3239_s3 = sld [smem:[#allocation31_spill]] }
 0xee9   : > { %v1474_v37 = vpop.permute.xlu0 %1473 }
 0xeea   : > { %1476 = vst.msk [vmem:[#allocation3] sm:$0xff] %vm940_vm7, %v1474_v37 }
 0xeee   : > { %v1875_v23 = vld [vmem:[%s3239_s3 + $0x18] sm:$0xff]  ;;  %v1873_v25 = vld [vmem:[%s3239_s3 + $0x8] sm:$0xff] }
 0xeef   : > { %1892 = vmatpush.msra.mxu3 %v1875_v23 }
 0xf2e   : > { %v1622_v42 = vpop.permute.xlu2 %1621 }
 0xf5a   : > { %v1548_v41 = vpop.permute.xlu1 %1547 }
 0xf5b   : > { %1550 = vst.msk [vmem:[#allocation3] sm:$0xff] %vm1015_vm8, %v1548_v41 }
 0xf5c   : > { %1624 = vst.msk [vmem:[#allocation3] sm:$0xff] %vm1090_vm9, %v1622_v42 }
 0xf63   : > { %v1625_v43 = vld [vmem:[#allocation3] sm:$0xff] }
 0xf64   : > { %2083 = vmatmul.msk.f32.vlgmr.msrb.gmra.mxu3 %vm724_vm0, %v1625_v43 }
 0xfe7   : > { %v1656_v46 = vpop.f32.mrf.mxu3 }
 0xfe8   : > { %v1657_v47 = vadd.f32 %v2224_v45, %v1656_v46 }
 0xfea   : > { %v1659_v48 = vadd.f32 %v1657_v47, %v2950_v29  ;;  %v2088_v29 = vld [vmem:[%s3169_s10 + $0x30] sm:$0xff] }
 0xfeb   : > { %1720 = vmatpush.msrb.mxu0 %v2088_v29 }
 0xfec   : > { %v1664_v49 = vsel %vm724_vm0, %v1659_v48, 0.0 }
 0xfed   : > { %1665 = vadd.xlane.f32.xlu0 %v1664_v49  ;;  %1721 = vmatpush.msrb.mxu0 %v2087_v56 }
 0xfef   : > { %1722 = vmatpush.msrb.mxu0 %v2086_v57 }
0x1060   : > { %v1666_v50 = vpop.xlane.xlu0 %1665 }
0x1061   : > { %v1667_v51 = vmul.f32 %v1666_v50, %v2768_v8 }
0x1063   : > { %v1668_v52 = vsub.f32 %v1659_v48, %v1667_v51 }
0x1065   : > { %v1669_v53 = vmul.f32 %v1668_v52, %v1668_v52 }
0x1067   : > { %v1670_v54 = vsel %vm724_vm0, %v1669_v53, 0.0 }
0x1068   : > { %1671 = vadd.xlane.f32.xlu1 %v1670_v54 }
0x10db   : > { %v1672_v58 = vpop.xlane.xlu1 %1671 }
0x10dc   : > { %v1673_v32 = vmul.f32 %v1672_v58, %v2768_v8 }
0x10de   : > { %v1674_v59 = vadd.f32 1e-05, %v1673_v32 }
0x10e0   : > { %2273 = vrsqrt.f32 %v1674_v59  ;;  %vm1681_vm6 = vweird.f32 %v1674_v59 }
0x10e6   : > { %v2274_v60 = vpop.eup %2273 }
0x10e7   : > { %v1676_v61 = vmul.f32 %v2274_v60, %v1674_v59  ;;  %vm1682_vm5 = vweird.f32 %v2274_v60  ;;  %v2228_v59 = vld [vmem:[%s3172_s13 + $0x1] ss:$0 sm:$0xff] }
0x10e8   : > { %vm1683_vm7 = vmor %vm1681_vm6, %vm1682_vm5 }
0x10e9   : > { %v1677_v62 = vmul.f32 %v2274_v60, %v1676_v61 }
0x10eb   : > { %v1678_v63 = vmul.f32 0.5, %v1677_v62 }
0x10ed   : > { %v1679_v0 = vsub.f32 1.5, %v1678_v63 }
0x10ef   : > { %v1680_v1 = vmul.f32 %v2274_v60, %v1679_v0 }
0x10f1   : > { %v1684_v3 = vsel %vm1683_vm7, %v2274_v60, %v1680_v1 }
0x10f2   : > { %v1685_v4 = vmul.f32 %v1684_v3, %v1668_v52 }
0x10f4   : > { %v1689_v6 = vmul.f32 %v2225_v2, %v1685_v4 }
0x10f6   : > { %v3053_v7 = vadd.f32 %v2226_v5, %v1689_v6  ;;  %v1846_v5 = vld [vmem:[%s3238_s15 + $0x18] sm:$0xff]  ;;  %v1845_v6 = vld [vmem:[%s3238_s15 + $0x10] sm:$0xff] }
0x10f7   : > { %1863 = vmatpush.msra.mxu1 %v1846_v5 }
0x10f8   : > { %2091 = vmatmul.msk.f32.vlgmr.msrb.gmra.mxu0 %vm724_vm0, %v3053_v7 }
0x10f9   : > { %1864 = vmatpush.msra.mxu1 %v1845_v6 }
0x1175   : > { %v1724_v10 = vpop.f32.mrf.mxu0 }
0x1176   : > { %v1725_v11 = vadd.f32 %v2227_v9, %v1724_v10  ;;  %v1843_v9 = vld [vmem:[%s3238_s15] sm:$0xff] }
0x1178   : > { %v1728_v12 = vmul.f32 0.70710677, %v1725_v11  ;;  %v1727_v57 = vmul.f32 0.5, %v1725_v11 }
0x117a   : > { %v1729_v13 = vmul.f32 %v1728_v12, %v1728_v12 }
0x117c   : > { %v1730_v14 = vmin.f32 %v1729_v13, 16.0 }
0x117e   : > { %v1731_v15 = vmul.f32 2.1237322e-06, %v1730_v14  ;;  %v1742_v16 = vmul.f32 3.8918573e-05, %v1730_v14 }
0x1180   : > { %v1732_v18 = vadd.f32 0.00028619796, %v1731_v15  ;;  %v1743_v19 = vadd.f32 0.001143296, %v1742_v16 }
0x1182   : > { %v1733_v21 = vmul.f32 %v1732_v18, %v1730_v14  ;;  %v1744_v22 = vmul.f32 %v1743_v19, %v1730_v14  ;;  %v2229_v18 = vld [vmem:[%s3173_s14 + $0x1] ss:$0 sm:$0xff] }
0x1184   : > { %v1745_v24 = vadd.f32 0.014752088, %v1744_v22  ;;  %v1734_v26 = vadd.f32 0.0036580483, %v1733_v21  ;;  %v2230_v21 = vld [vmem:[#allocation10 + $0x1] ss:$0 sm:$0xff] }
0x1186   : > { %v1746_v27 = vmul.f32 %v1745_v24, %v1730_v14  ;;  %v1735_v33 = vmul.f32 %v1734_v26, %v1730_v14  ;;  %v1874_v24 = vld [vmem:[%s3239_s3 + $0x10] sm:$0xff]  ;;  %v1872_v26 = vld [vmem:[%s3239_s3] sm:$0xff]  ;;  %s2445_s3 = sshra.s32 %s1916_s20, 4  ;;  %s2446_s3 = int_to_ptr.hbm [resolvable:$true] %s2445_s3 }
0x1187   : > { %1893 = vmatpush.msra.mxu3 %v1874_v24  ;;  %s2447_s4 = scalar_lea.hbm %s2446_s3, 1  ;;  %p2452_p7 = scmp.lt.s32.totalorder %s2446_s3, %s3241_s25 }
0x1188   : > { %v1747_v30 = vadd.f32 0.112945676, %v1746_v27  ;;  %v1736_v38 = vadd.f32 0.05243302, %v1735_v33  ;;  %v1847_v27 = vld [vmem:[#allocation12] sm:$0x1]  ;;  %p2448_p3 = scmp.ne.s32.totalorder %s2446_s3, %s2447_s4  ;;  %p2453_p8 = scmp.lt.s32.totalorder %s2451_s26, %s2447_s4 }
0x1189   : > { %1894 = vmatpush.msra.mxu3 %v1873_v25  ;;  %v1876_v33 = vld [vmem:[%s3242_s29] sm:$0x1] }
0x118a   : > { %v1748_v35 = vmul.f32 %v1747_v30, %v1730_v14  ;;  %v1737_v40 = vmul.f32 %v1736_v38, %v1730_v14  ;;  %p2449_p4 = pnand %p2448_p3, %p2720_p5  ;;  %p2454_p9 = por %p2453_p8, %p2452_p7 }
0x118b   : > { %1895 = vmatpush.msra.mxu3 %v1872_v26 }
0x118c   : > { %v1749_v37 = vadd.f32 0.4994258, %v1748_v35  ;;  %v1738_v41 = vadd.f32 0.18741608, %v1737_v40  ;;  %p2450_p12 = pneg %p2449_p4 }
0x118e   : > { %v1750_v36 = vmul.f32 %v1749_v37, %v1730_v14  ;;  %v1739_v43 = vmul.f32 %v1738_v41, %v1730_v14  ;;  %p2455_p10 = pnand %p2454_p9, %p2450_p12 }
0x1190   : > { %v1751_v39 = vadd.f32 1.0, %v1750_v36  ;;  %v1740_v48 = vadd.f32 1.1283791, %v1739_v43 }
0x1192   : > { %2275 = vrcp.f32 %v1751_v39  ;;  %v1763_v47 = vand.u32 2147483648, %v1751_v39  ;;  %v1761_v50 = vand.u32 2147483647, %v1751_v39  ;;  %vm1757_vm9 = vweird.f32 %v1751_v39 }
0x1193   : > { %v1741_v53 = vmul.f32 %v1740_v48, %v1728_v12 }
0x1194   : > { %v1764_v52 = vor.u32 1.1754944e-38, %v1763_v47  ;;  %vm1762_vm12 = vcmp.eq.f32.partialorder %v1761_v50, 8.507059e+37 }
0x1198   : > { %v2276_v42 = vpop.eup %2275 }
0x1199   : > { %v1753_v45 = vmul.f32 %v2276_v42, %v1751_v39  ;;  %vm1758_vm8 = vweird.f32 %v2276_v42 }
0x119a   : > { %vm1759_vm11 = vmor %vm1757_vm9, %vm1758_vm8 }
0x119b   : > { %v1754_v46 = vsub.f32 1.0, %v1753_v45 }
0x119d   : > { %v1755_v49 = vmul.f32 %v2276_v42, %v1754_v46 }
0x119f   : > { %v1756_v51 = vadd.f32 %v2276_v42, %v1755_v49 }
0x11a1   : > { %v1760_v54 = vsel %vm1759_vm11, %v2276_v42, %v1756_v51 }
0x11a2   : > { %v1765_v55 = vsel %vm1762_vm12, %v1764_v52, %v1760_v54 }
0x11a3   : > { %v1766_v29 = vmul.f32 %v1765_v55, %v1741_v53 }
0x11a5   : > { %v2092_v56 = vclamps-f32 %v1766_v29, 1.0 }
0x11a7   : > { %v1769_v58 = vadd.f32 1.0, %v2092_v56 }
0x11a9   : > { %v1770_v32 = vmul.f32 %v1769_v58, %v1727_v57 }
0x11ab   : > { %2102 = vmatmul.msk.f32.vlgmr.msrb.gmra.mxu2 %vm1244_vm2, %v1770_v32 }
0x122e   : > { %v1805_v60 = vpop.f32.mrf.mxu2 }
0x122f   : > { %v1806_v61 = vadd.f32 %v2228_v59, %v1805_v60 }
0x1231   : > { %v1808_v62 = vadd.f32 %v1806_v61, %v3053_v7  ;;  %v1844_v7 = vld [vmem:[%s3238_s15 + $0x8] sm:$0xff] }
0x1232   : > { %1865 = vmatpush.msra.mxu1 %v1844_v7 }
0x1233   : > { %v1813_v63 = vsel %vm724_vm0, %v1808_v62, 0.0 }
0x1234   : > { %1814 = vadd.xlane.f32.xlu2 %v1813_v63  ;;  %1866 = vmatpush.msra.mxu1 %v1843_v9 }
0x12a7   : > { %v1815_v0 = vpop.xlane.xlu2 %1814 }
0x12a8   : > { %v1816_v1 = vmul.f32 %v1815_v0, %v2768_v8 }
0x12aa   : > { %v1817_v2 = vsub.f32 %v1808_v62, %v1816_v1 }
0x12ac   : > { %v1818_v3 = vmul.f32 %v1817_v2, %v1817_v2 }
0x12ae   : > { %v1819_v4 = vsel %vm724_vm0, %v1818_v3, 0.0 }
0x12af   : > { %1820 = vadd.xlane.f32.xlu0 %v1819_v4 }
0x1322   : > { %v1821_v10 = vpop.xlane.xlu0 %1820 }
0x1323   : > { %v1822_v11 = vmul.f32 %v1821_v10, %v2768_v8 }
0x1325   : > { %v1823_v12 = vadd.f32 1e-05, %v1822_v11 }
0x1327   : > { %2277 = vrsqrt.f32 %v1823_v12  ;;  %vm1830_vm14 = vweird.f32 %v1823_v12 }
0x132d   : > { %v2278_v13 = vpop.eup %2277 }
0x132e   : > { %v1825_v14 = vmul.f32 %v2278_v13, %v1823_v12  ;;  %vm1831_vm13 = vweird.f32 %v2278_v13 }
0x132f   : > { %vm1832_vm15 = vmor %vm1830_vm14, %vm1831_vm13 }
0x1330   : > { %v1826_v44 = vmul.f32 %v2278_v13, %v1825_v14 }
0x1332   : > { %v1827_v15 = vmul.f32 0.5, %v1826_v44 }
0x1334   : > { %v1828_v16 = vsub.f32 1.5, %v1827_v15 }
0x1336   : > { %v1829_v17 = vmul.f32 %v2278_v13, %v1828_v16 }
0x1338   : > { %v1833_v19 = vsel %vm1832_vm15, %v2278_v13, %v1829_v17 }
0x1339   : > { %v1834_v20 = vmul.f32 %v1833_v19, %v1817_v2 }
0x133b   : > { %v1838_v22 = vmul.f32 %v2229_v18, %v1834_v20 }
0x133d   : > { %v1842_v8 = vadd.f32 %v2230_v21, %v1838_v22 }
0x133f   : > { %2104 = vmatmul.msk.f32.vlgmr.msra.gmra.mxu1 %vm724_vm0, %v1842_v8 }
0x13bc   : > { %v1868_v28 = vpop.f32.mrf.mxu1 }
0x13bd   : > { %v1869_v30 = vadd.f32 %v1868_v28, %v1847_v27 }
0x13bf   : > { %2279 = vtanh.f32 %v1869_v30 }
0x13c5   : > { %v2280_v31 = vpop.eup %2279 }
0x13c6   : > { %2105 = vmatmul.msk.f32.vlgmr.msra.gmra.mxu3 %vm724_vm0, %v2280_v31 }
0x1449   : > { %v1897_v34 = vpop.f32.mrf.mxu3 }
0x144a   : > { %v1898_v35 = vadd.f32 %v1897_v34, %v1876_v33 }
0x144c   : > { %1901 = vst.msk [vmem:[%s716_s18] sm:$0x1] %vm1900_vm1, %v1898_v35 }
0x144d   : > { %2458 = shalt.err (!%p2455_p10)
}
0x144e   : > { %2126 = dma.vmem_to_hbm [thread:$0]  (%p2720_p5), %s1914_s16, 16, %s1916_s20, %s1903_s17  }
0x144f PF: > { %s3243_s2 = sld [smem:[#allocation18_spill]]  ;;  %p3245_p13 = scmp.ge.s32.totalorder %s2505_s24, 2 }
0x1451   : > { %p2146_p11 = pnand %p3245_p13, %p2724_p6 }
0x1453   : > { %p2147_p0 = pneg %p2146_p11 }
0x1455   : > { %s1927_s19 = sand.u32 1, %s3243_s2  }
0x1456   : > { %s1928_s29 = scalar_lea.sflag [#allocation6], %s1927_s19 }
0x1457   : > { %2488 = dma.done.wait (%p2147_p0), %s1928_s29, 16  }
0x1458   : > { %2490 = vsyncadd (%p2147_p0), %s1928_s29, 4294967280  ;;  %s3246_s24 = sld [smem:[#allocation20_spill]]  ;;  %s3249_s1 = smov %s2497_s22 }
0x1459   : > { %s3247_s4 = sld [smem:[#allocation19_spill]] }
0x145a   : > { %s3248_s23 = sld [smem:[#allocation21_spill]] }
0x145e   : > { %p35_p2 = scmp.ge.s32.totalorder %s3246_s24, 4  }
0x145f   : > { %s3250_s22 = smov %s3247_s4 }
0x1460   :  { %37 = sbr.rel (!%p35_p2) target bundleno = 19 (0x13), region = 176 }
0x1465   :  { %1933 = vsyncpa [#allocation5], 1 }
0x1466   :  { %1935 = vsyncpa [#allocation5 + $0x1], 1 }
0x1467   :  { %1936 = vsyncpa [#allocation8], 1 }
0x1468   :  { %1937 = vsyncpa [#allocation11], 1 }
0x1469   :  { %1938 = vsyncpa [#allocation6], 1 }
0x146a   :  { %1940 = vsyncpa [#allocation6 + $0x1], 1 }

</bundles_post_ra>
